<compile_context>
chip_gen: v7x
topology: tpu7x:2x2x1
jax: 0.10.0
libtpu: 0.0.40
codegen_flags: <defaults>
</compile_context>

<pallas_src>
import jax
import jax.numpy as jnp
from jax.experimental import pallas as pl
from jax.experimental.pallas import tpu as pltpu


def _silu(x):
    # sigmoid via EUP exp + approximate reciprocal (frees VALU slots).
    return x * pl.reciprocal(1.0 + jnp.exp(-x), approx=True)


def summer_kernel(x_ref,
                  wq_ref, wo_ref, wgr_ref, wgi_ref,
                  bq_ref, bo_ref, bgr_ref, bgi_ref,
                  wconv_ref, bconv_ref, wfrom_ref,
                  wmr_ref, wmi_ref, bmr_ref, bmi_ref,
                  wor_ref, woi_ref, bout_ref,
                  fr_ref, fi_ref, gamma_ref,
                  out_ref):
    BT, N, D = x_ref.shape
    K = wconv_ref.shape[0]
    pad = K // 2
    R = BT * N

    def mm(a, w):
        # bf16 MXU inputs, f32 accumulation; elementwise math stays f32.
        return jnp.dot(a.astype(jnp.bfloat16), w,
                       preferred_element_type=jnp.float32)

    xf = x_ref[...].reshape(R, D)

    # ---- in_proj (weights pre-split: q / o / gate-real-half / gate-imag-half)
    q = mm(xf, wq_ref[...]) + bq_ref[...]
    o = mm(xf, wo_ref[...]) + bo_ref[...]
    gr = mm(xf, wgr_ref[...]) + bgr_ref[...]
    gi = mm(xf, wgi_ref[...]) + bgi_ref[...]

    # Sequence index (within its own batch element) of each flattened row.
    n_local = jax.lax.broadcasted_iota(jnp.int32, (BT, N, D), 1).reshape(R, D)

    # ---- GlobalConv: Conv1d over the sequence = K rolled (XLU) + masked taps,
    # each contracted on the MXU against its (D, D) weight slab.
    conv = None
    for k in range(K):
        s = k - pad                              # tap reads q[n + s]
        if s == 0:
            tap = q
        else:
            tap = pltpu.roll(q, shift=(-s) % R, axis=0)   # tap[r] = q[r + s]
            valid = jnp.logical_and(n_local + s >= 0, n_local + s < N)
            tap = jnp.where(valid, tap, 0.0)
        term = mm(tap, wconv_ref[k])
        conv = term if conv is None else conv + term
    conv = conv + bconv_ref[...]

    cxf = _silu(conv)
    scale = 1.0 / float(D) ** 0.5
    logits = mm(cxf, wfrom_ref[...]) * scale

    # softmax over the sequence axis (dim=-2), per batch element
    logits3 = logits.reshape(BT, N, D)
    m = jnp.max(logits3, axis=1, keepdims=True)
    e = jnp.exp(logits3 - m)
    denom = jnp.sum(e, axis=1, keepdims=True)
    sm3 = e * pl.reciprocal(denom, approx=True)
    glob3 = jnp.sum(q.reshape(BT, N, D) * sm3, axis=1, keepdims=True)  # (BT,1,D)

    # ---- mid_proj(o * glob_summary), weights pre-split into real/imag halves
    og = (o.reshape(BT, N, D) * glob3).reshape(R, D)
    gamma = gamma_ref[...]
    in_r = gamma * (mm(og, wmr_ref[...]) + bmr_ref[...])
    in_i = gamma * (mm(og, wmi_ref[...]) + bmi_ref[...])

    # ---- complex linear recurrence  h_t = f * h_{t-1} + x_t  ----
    # Log-depth inclusive scan: at stride s, h += f^s * shift(h, s).  Rows with
    # sequence index < s (which also covers batch boundaries in the flattened
    # layout) are masked to zero, so each batch element scans independently.
    hr, hi = in_r, in_i
    pr = fr_ref[...]                 # (1, D) complex decay f, raised to 2^step
    pi = fi_ref[...]
    stride = 1
    for _ in range((N - 1).bit_length()):
        valid = n_local >= stride
        rr = jnp.where(valid, pltpu.roll(hr, shift=stride, axis=0), 0.0)
        ri = jnp.where(valid, pltpu.roll(hi, shift=stride, axis=0), 0.0)
        hr, hi = hr + pr * rr - pi * ri, hi + pr * ri + pi * rr
        pr, pi = pr * pr - pi * pi, 2.0 * pr * pi       # f^(2s)
        stride *= 2

    # ---- gate, RMSNorm over (real ++ imag) 2D features (no concat), out_proj
    # TODO(synk): dropout(p=0.2) is identity here (inference mode).
    y_r = hr * _silu(gr)
    y_i = hi * _silu(gi)
    ms = (jnp.sum(y_r * y_r, axis=-1, keepdims=True) +
          jnp.sum(y_i * y_i, axis=-1, keepdims=True)) * (1.0 / (2.0 * D))
    inv = jax.lax.rsqrt(ms + 1e-5)
    y_r = y_r * inv
    y_i = y_i * inv
    out = mm(y_r, wor_ref[...]) + mm(y_i, woi_ref[...]) + bout_ref[...]
    out_ref[...] = out.reshape(BT, N, D).astype(out_ref.dtype)


def _pick_b_tile(B, N, target_rows=512):
    """Largest batch tile (divisor of B) with <= target_rows matmul rows while
    keeping >= 2 grid steps when possible (so both v7x TensorCores get work)."""
    cands = [d for d in range(1, B + 1) if B % d == 0 and d * N <= target_rows]
    if not cands:
        return 1
    multi = [d for d in cands if B // d >= 2]
    return max(multi) if multi else max(cands)


def summer_forward(x, params, b_tile=None):
    (win, bin_, wconv, bconv, wfrom, wmid, bmid, wout, bout,
     f_real, f_imag, gamma) = params
    B, N, D = x.shape
    K = wconv.shape[0]
    if b_tile is None:
        b_tile = _pick_b_tile(B, N)
    assert B % b_tile == 0

    bf16 = jnp.bfloat16
    # Pre-split projection weights so the kernel never slices/concats along the
    # lane (feature) axis; cast matmul weights to bf16 (f32 accumulation).
    wq, wo = win[:, :D].astype(bf16), win[:, D:2 * D].astype(bf16)
    wgr, wgi = win[:, 2 * D:3 * D].astype(bf16), win[:, 3 * D:].astype(bf16)
    bq, bo = bin_[:, :D], bin_[:, D:2 * D]
    bgr, bgi = bin_[:, 2 * D:3 * D], bin_[:, 3 * D:]
    wconv_b = wconv.astype(bf16)
    wfrom_b = wfrom.astype(bf16)
    wmr, wmi = wmid[:, :D].astype(bf16), wmid[:, D:].astype(bf16)
    bmr, bmi = bmid[:, :D], bmid[:, D:]
    wor, woi = wout[:D].astype(bf16), wout[D:].astype(bf16)

    operands = (wq, wo, wgr, wgi, bq, bo, bgr, bgi, wconv_b, bconv, wfrom_b,
                wmr, wmi, bmr, bmi, wor, woi, bout, f_real, f_imag, gamma)

    def full(a):
        nd = a.ndim
        return pl.BlockSpec(a.shape, lambda b: (0,) * nd)

    flops = 2 * B * N * D * D * (4 + K + 1 + 2 + 2)
    transcendentals = 5 * B * N * D
    bytes_accessed = (int(x.size) * x.dtype.itemsize + B * N * D * 4 +
                      sum(int(a.size) * a.dtype.itemsize for a in operands))

    # NOTE: at production sizes, weight BlockSpecs should use
    # pipeline_mode=pl.Buffered(1) (their block index never changes) or stream
    # the contraction, to halve weight VMEM residency (critical on v7x/64 MiB).
    return pl.pallas_call(
        summer_kernel,
        out_shape=jax.ShapeDtypeStruct((B, N, D), jnp.float32),
        grid=(B // b_tile,),
        in_specs=[pl.BlockSpec((b_tile, N, D), lambda b: (b, 0, 0))]
                 + [full(a) for a in operands],
        out_specs=pl.BlockSpec((b_tile, N, D), lambda b: (b, 0, 0)),
        compiler_params=pltpu.CompilerParams(
            dimension_semantics=("parallel",),
            vmem_limit_bytes=32 * 1024 * 1024),
        cost_estimate=pl.CostEstimate(
            flops=flops, transcendentals=transcendentals,
            bytes_accessed=bytes_accessed),
    )(x, *operands)


def init_params(key, d_model, d_conv):
    D, K = d_model, d_conv
    ks = jax.random.split(key, 12)
    nrm = lambda k, shp, fan_in: (jax.random.normal(k, shp, jnp.float32)
                                  / jnp.sqrt(jnp.float32(fan_in)))
    win = nrm(ks[0], (D, 4 * D), D)
    bin_ = 0.01 * jax.random.normal(ks[1], (1, 4 * D), jnp.float32)
    wconv = nrm(ks[2], (K, D, D), D * K)
    bconv = 0.01 * jax.random.normal(ks[3], (1, D), jnp.float32)
    wfrom = nrm(ks[4], (D, D), D)
    wmid = nrm(ks[5], (D, 2 * D), D)
    bmid = 0.01 * jax.random.normal(ks[6], (1, 2 * D), jnp.float32)
    wout = nrm(ks[7], (2 * D, D), 2 * D)
    bout = 0.01 * jax.random.normal(ks[8], (1, D), jnp.float32)

    # LRU-style initializer (same formulas as Summer.initializer) followed by
    # the forward-pass parameter transforms (exp / cos / sin) done as tiny
    # wrapper-side glue.
    r_min, r_max = 0.9, 0.999
    u1 = jax.random.uniform(ks[9], (D,), jnp.float32)
    u2 = jax.random.uniform(ks[10], (D,), jnp.float32)
    nu_log = jnp.log(-0.5 * jnp.log(u1 * (r_max ** 2 - r_min ** 2) + r_min ** 2))
    theta_log = jnp.log(u2 * jnp.pi * 2.0)
    gamma_log = jnp.log(jnp.sqrt(1.0 - jnp.exp(-jnp.exp(nu_log)) ** 2))
    nu = jnp.exp(-jnp.exp(nu_log))
    theta = jnp.exp(theta_log)
    f_real = (nu * jnp.cos(theta)).reshape(1, D)
    f_imag = (nu * jnp.sin(theta)).reshape(1, D)
    gamma = jnp.exp(gamma_log).reshape(1, D)
    return (win, bin_, wconv, bconv, wfrom, wmid, bmid, wout, bout,
            f_real, f_imag, gamma)


def reference_forward(x, params):
    """Pure-JAX reference mirroring the kernel's mixed precision
    (bf16 matmul inputs, f32 accumulation) for the correctness check."""
    (win, bin_, wconv, bconv, wfrom, wmid, bmid, wout, bout,
     f_real, f_imag, gamma) = params
    B, N, D = x.shape
    K = wconv.shape[0]
    pad = K // 2
    bf16 = jnp.bfloat16

    def mm(a, w):
        return jnp.dot(a.astype(bf16), w.astype(bf16),
                       preferred_element_type=jnp.float32)

    u = mm(x, win) + bin_
    q, o, g = u[..., :D], u[..., D:2 * D], u[..., 2 * D:]

    qp = jnp.pad(q, ((0, 0), (pad, pad), (0, 0)))
    conv = bconv
    for k in range(K):
        conv = conv + mm(qp[:, k:k + N, :], wconv[k])
    cxf = jax.nn.silu(conv)
    logits = mm(cxf, wfrom) / jnp.sqrt(jnp.float32(D))
    sm = jax.nn.softmax(logits, axis=-2)
    glob = jnp.sum(q * sm, axis=-2, keepdims=True)

    v = mm(o * glob, wmid) + bmid
    in_real = gamma * v[..., :D]
    in_imag = gamma * v[..., D:]

    def step(carry, xt):
        hr, hi = carry
        xr, xi = xt
        nr = f_real[0] * hr - f_imag[0] * hi + xr
        ni = f_real[0] * hi + f_imag[0] * hr + xi
        return (nr, ni), (nr, ni)

    xr_t = jnp.transpose(in_real, (1, 0, 2))
    xi_t = jnp.transpose(in_imag, (1, 0, 2))
    _, (or_t, oi_t) = jax.lax.scan(
        step, (jnp.zeros((B, D)), jnp.zeros((B, D))), (xr_t, xi_t))
    out_real = jnp.transpose(or_t, (1, 0, 2))
    out_imag = jnp.transpose(oi_t, (1, 0, 2))

    y = jnp.concatenate([out_real, out_imag], axis=-1) * jax.nn.silu(g)
    y = y * jax.lax.rsqrt(jnp.mean(y * y, axis=-1, keepdims=True) + 1e-5)
    return mm(y, wout) + bout


if __name__ == "__main__":
    B, N, D, K = 2, 8, 32, 3          # batch, seq, d_model, d_conv
    key = jax.random.PRNGKey(0)
    kx, kp = jax.random.split(key)
    x = jax.random.normal(kx, (B, N, D), jnp.float32)
    params = init_params(kp, D, K)

    ref = jax.block_until_ready(reference_forward(x, params))

    # Default tiling (keeps >=2 grid steps for the two v7x TensorCores).
    out = jax.block_until_ready(summer_forward(x, params))
    assert out.shape == (B, N, D) and out.dtype == jnp.float32

    import numpy as np
    np.testing.assert_allclose(np.asarray(out), np.asarray(ref),
                               rtol=2e-2, atol=2e-2)

    # Also exercise the batch-folded path (whole batch in one grid step).
    out2 = jax.block_until_ready(summer_forward(x, params, b_tile=B))
    np.testing.assert_allclose(np.asarray(out2), np.asarray(ref),
                               rtol=2e-2, atol=2e-2)
    print("KERNEL_OK")
</pallas_src>

<mosaic_0001>
module attributes {stable_mosaic.version = 11 : i64} {
  func.func @summer_kernel(%arg0: i32, %arg1: memref<1x8x32xf32, #tpu.memory_space<vmem>>, %arg2: memref<32x32xbf16, #tpu.memory_space<vmem>>, %arg3: memref<32x32xbf16, #tpu.memory_space<vmem>>, %arg4: memref<32x32xbf16, #tpu.memory_space<vmem>>, %arg5: memref<32x32xbf16, #tpu.memory_space<vmem>>, %arg6: memref<1x32xf32, #tpu.memory_space<vmem>>, %arg7: memref<1x32xf32, #tpu.memory_space<vmem>>, %arg8: memref<1x32xf32, #tpu.memory_space<vmem>>, %arg9: memref<1x32xf32, #tpu.memory_space<vmem>>, %arg10: memref<3x32x32xbf16, #tpu.memory_space<vmem>>, %arg11: memref<1x32xf32, #tpu.memory_space<vmem>>, %arg12: memref<32x32xbf16, #tpu.memory_space<vmem>>, %arg13: memref<32x32xbf16, #tpu.memory_space<vmem>>, %arg14: memref<32x32xbf16, #tpu.memory_space<vmem>>, %arg15: memref<1x32xf32, #tpu.memory_space<vmem>>, %arg16: memref<1x32xf32, #tpu.memory_space<vmem>>, %arg17: memref<32x32xbf16, #tpu.memory_space<vmem>>, %arg18: memref<32x32xbf16, #tpu.memory_space<vmem>>, %arg19: memref<1x32xf32, #tpu.memory_space<vmem>>, %arg20: memref<1x32xf32, #tpu.memory_space<vmem>>, %arg21: memref<1x32xf32, #tpu.memory_space<vmem>>, %arg22: memref<1x32xf32, #tpu.memory_space<vmem>>, %arg23: memref<1x8x32xf32, #tpu.memory_space<vmem>>) attributes {dimension_semantics = [#tpu.dimension_semantics<parallel>], iteration_bounds = array<i64: 2>, scalar_prefetch = 0 : i64, scratch_operands = 0 : i64, tpu.core_type = #tpu.core_type<tc>, window_params = [{transform_indices = @transform_0, window_bounds = array<i64: 1, 8, 32>}, {pipeline_mode = #tpu.pipeline_mode<synchronous>, transform_indices = @transform_1, window_bounds = array<i64: 32, 32>}, {pipeline_mode = #tpu.pipeline_mode<synchronous>, transform_indices = @transform_2, window_bounds = array<i64: 32, 32>}, {pipeline_mode = #tpu.pipeline_mode<synchronous>, transform_indices = @transform_3, window_bounds = array<i64: 32, 32>}, {pipeline_mode = #tpu.pipeline_mode<synchronous>, transform_indices = @transform_4, window_bounds = array<i64: 32, 32>}, {pipeline_mode = #tpu.pipeline_mode<synchronous>, transform_indices = @transform_5, window_bounds = array<i64: 1, 32>}, {pipeline_mode = #tpu.pipeline_mode<synchronous>, transform_indices = @transform_6, window_bounds = array<i64: 1, 32>}, {pipeline_mode = #tpu.pipeline_mode<synchronous>, transform_indices = @transform_7, window_bounds = array<i64: 1, 32>}, {pipeline_mode = #tpu.pipeline_mode<synchronous>, transform_indices = @transform_8, window_bounds = array<i64: 1, 32>}, {pipeline_mode = #tpu.pipeline_mode<synchronous>, transform_indices = @transform_9, window_bounds = array<i64: 3, 32, 32>}, {pipeline_mode = #tpu.pipeline_mode<synchronous>, transform_indices = @transform_10, window_bounds = array<i64: 1, 32>}, {pipeline_mode = #tpu.pipeline_mode<synchronous>, transform_indices = @transform_11, window_bounds = array<i64: 32, 32>}, {pipeline_mode = #tpu.pipeline_mode<synchronous>, transform_indices = @transform_12, window_bounds = array<i64: 32, 32>}, {pipeline_mode = #tpu.pipeline_mode<synchronous>, transform_indices = @transform_13, window_bounds = array<i64: 32, 32>}, {pipeline_mode = #tpu.pipeline_mode<synchronous>, transform_indices = @transform_14, window_bounds = array<i64: 1, 32>}, {pipeline_mode = #tpu.pipeline_mode<synchronous>, transform_indices = @transform_15, window_bounds = array<i64: 1, 32>}, {pipeline_mode = #tpu.pipeline_mode<synchronous>, transform_indices = @transform_16, window_bounds = array<i64: 32, 32>}, {pipeline_mode = #tpu.pipeline_mode<synchronous>, transform_indices = @transform_17, window_bounds = array<i64: 32, 32>}, {pipeline_mode = #tpu.pipeline_mode<synchronous>, transform_indices = @transform_18, window_bounds = array<i64: 1, 32>}, {pipeline_mode = #tpu.pipeline_mode<synchronous>, transform_indices = @transform_19, window_bounds = array<i64: 1, 32>}, {pipeline_mode = #tpu.pipeline_mode<synchronous>, transform_indices = @transform_20, window_bounds = array<i64: 1, 32>}, {pipeline_mode = #tpu.pipeline_mode<synchronous>, transform_indices = @transform_21, window_bounds = array<i64: 1, 32>}, {transform_indices = @transform_22, window_bounds = array<i64: 1, 8, 32>}]} {
    %c0 = arith.constant 0 : index
    %c0_0 = arith.constant 0 : index
    %c0_1 = arith.constant 0 : index
    %0 = vector.load %arg1[%c0, %c0_0, %c0_1] : memref<1x8x32xf32, #tpu.memory_space<vmem>>, vector<1x8x32xf32>
    %1 = vector.shape_cast %0 : vector<1x8x32xf32> to vector<8x32xf32>
    %c0_2 = arith.constant 0 : index
    %c0_3 = arith.constant 0 : index
    %2 = vector.load %arg2[%c0_2, %c0_3] : memref<32x32xbf16, #tpu.memory_space<vmem>>, vector<32x32xbf16>
    %3 = arith.truncf %1 : vector<8x32xf32> to vector<8x32xbf16>
    %cst = arith.constant dense<0.000000e+00> : vector<8x32xf32>
    %4 = tpu.matmul %3, %2, %cst {dimension_numbers = #tpu.dot_dimension_numbers<[1], [0], [0], [1], [0, 0, 1, 1], [], []>} : vector<8x32xbf16>, vector<32x32xbf16>, vector<8x32xf32> -> vector<8x32xf32>
    %c0_4 = arith.constant 0 : index
    %c0_5 = arith.constant 0 : index
    %5 = vector.load %arg6[%c0_4, %c0_5] : memref<1x32xf32, #tpu.memory_space<vmem>>, vector<1x32xf32>
    %6 = vector.broadcast %5 : vector<1x32xf32> to vector<8x32xf32>
    %7 = arith.addf %4, %6 : vector<8x32xf32>
    %c0_6 = arith.constant 0 : index
    %c0_7 = arith.constant 0 : index
    %8 = vector.load %arg3[%c0_6, %c0_7] : memref<32x32xbf16, #tpu.memory_space<vmem>>, vector<32x32xbf16>
    %9 = arith.truncf %1 : vector<8x32xf32> to vector<8x32xbf16>
    %cst_8 = arith.constant dense<0.000000e+00> : vector<8x32xf32>
    %10 = tpu.matmul %9, %8, %cst_8 {dimension_numbers = #tpu.dot_dimension_numbers<[1], [0], [0], [1], [0, 0, 1, 1], [], []>} : vector<8x32xbf16>, vector<32x32xbf16>, vector<8x32xf32> -> vector<8x32xf32>
    %c0_9 = arith.constant 0 : index
    %c0_10 = arith.constant 0 : index
    %11 = vector.load %arg7[%c0_9, %c0_10] : memref<1x32xf32, #tpu.memory_space<vmem>>, vector<1x32xf32>
    %12 = vector.broadcast %11 : vector<1x32xf32> to vector<8x32xf32>
    %13 = arith.addf %10, %12 : vector<8x32xf32>
    %c0_11 = arith.constant 0 : index
    %c0_12 = arith.constant 0 : index
    %14 = vector.load %arg4[%c0_11, %c0_12] : memref<32x32xbf16, #tpu.memory_space<vmem>>, vector<32x32xbf16>
    %15 = arith.truncf %1 : vector<8x32xf32> to vector<8x32xbf16>
    %cst_13 = arith.constant dense<0.000000e+00> : vector<8x32xf32>
    %16 = tpu.matmul %15, %14, %cst_13 {dimension_numbers = #tpu.dot_dimension_numbers<[1], [0], [0], [1], [0, 0, 1, 1], [], []>} : vector<8x32xbf16>, vector<32x32xbf16>, vector<8x32xf32> -> vector<8x32xf32>
    %c0_14 = arith.constant 0 : index
    %c0_15 = arith.constant 0 : index
    %17 = vector.load %arg8[%c0_14, %c0_15] : memref<1x32xf32, #tpu.memory_space<vmem>>, vector<1x32xf32>
    %18 = vector.broadcast %17 : vector<1x32xf32> to vector<8x32xf32>
    %19 = arith.addf %16, %18 : vector<8x32xf32>
    %c0_16 = arith.constant 0 : index
    %c0_17 = arith.constant 0 : index
    %20 = vector.load %arg5[%c0_16, %c0_17] : memref<32x32xbf16, #tpu.memory_space<vmem>>, vector<32x32xbf16>
    %21 = arith.truncf %1 : vector<8x32xf32> to vector<8x32xbf16>
    %cst_18 = arith.constant dense<0.000000e+00> : vector<8x32xf32>
    %22 = tpu.matmul %21, %20, %cst_18 {dimension_numbers = #tpu.dot_dimension_numbers<[1], [0], [0], [1], [0, 0, 1, 1], [], []>} : vector<8x32xbf16>, vector<32x32xbf16>, vector<8x32xf32> -> vector<8x32xf32>
    %c0_19 = arith.constant 0 : index
    %c0_20 = arith.constant 0 : index
    %23 = vector.load %arg9[%c0_19, %c0_20] : memref<1x32xf32, #tpu.memory_space<vmem>>, vector<1x32xf32>
    %24 = vector.broadcast %23 : vector<1x32xf32> to vector<8x32xf32>
    %25 = arith.addf %22, %24 : vector<8x32xf32>
    %26 = tpu.iota {dimensions = array<i32: 1>} : vector<1x8x32xi32>
    %27 = vector.shape_cast %26 : vector<1x8x32xi32> to vector<8x32xi32>
    %c1_i32 = arith.constant 1 : i32
    %28 = tpu.dynamic_rotate %7 by %c1_i32 dim 0 : vector<8x32xf32>, i32 -> vector<8x32xf32>
    %c-1_i32 = arith.constant -1 : i32
    %29 = vector.broadcast %c-1_i32 : i32 to vector<8x32xi32>
    %30 = arith.addi %27, %29 : vector<8x32xi32>
    %c0_i32 = arith.constant 0 : i32
    %31 = vector.broadcast %c0_i32 : i32 to vector<8x32xi32>
    %32 = arith.cmpi sge, %30, %31 : vector<8x32xi32>
    %c-1_i32_21 = arith.constant -1 : i32
    %33 = vector.broadcast %c-1_i32_21 : i32 to vector<8x32xi32>
    %34 = arith.addi %27, %33 : vector<8x32xi32>
    %c8_i32 = arith.constant 8 : i32
    %35 = vector.broadcast %c8_i32 : i32 to vector<8x32xi32>
    %36 = arith.cmpi slt, %34, %35 : vector<8x32xi32>
    %37 = arith.andi %32, %36 : vector<8x32xi1>
    %cst_22 = arith.constant 0.000000e+00 : f32
    %38 = vector.broadcast %cst_22 : f32 to vector<8x32xf32>
    %39 = arith.select %37, %28, %38 : vector<8x32xi1>, vector<8x32xf32>
    %c0_23 = arith.constant 0 : index
    %c0_24 = arith.constant 0 : index
    %c0_25 = arith.constant 0 : index
    %40 = vector.load %arg10[%c0_23, %c0_24, %c0_25] : memref<3x32x32xbf16, #tpu.memory_space<vmem>>, vector<1x32x32xbf16>
    %41 = vector.shape_cast %40 : vector<1x32x32xbf16> to vector<32x32xbf16>
    %42 = arith.truncf %39 : vector<8x32xf32> to vector<8x32xbf16>
    %cst_26 = arith.constant dense<0.000000e+00> : vector<8x32xf32>
    %43 = tpu.matmul %42, %41, %cst_26 {dimension_numbers = #tpu.dot_dimension_numbers<[1], [0], [0], [1], [0, 0, 1, 1], [], []>} : vector<8x32xbf16>, vector<32x32xbf16>, vector<8x32xf32> -> vector<8x32xf32>
    %c1 = arith.constant 1 : index
    %c0_27 = arith.constant 0 : index
    %c0_28 = arith.constant 0 : index
    %44 = vector.load %arg10[%c1, %c0_27, %c0_28] : memref<3x32x32xbf16, #tpu.memory_space<vmem>>, vector<1x32x32xbf16>
    %45 = vector.shape_cast %44 : vector<1x32x32xbf16> to vector<32x32xbf16>
    %46 = arith.truncf %7 : vector<8x32xf32> to vector<8x32xbf16>
    %cst_29 = arith.constant dense<0.000000e+00> : vector<8x32xf32>
    %47 = tpu.matmul %46, %45, %cst_29 {dimension_numbers = #tpu.dot_dimension_numbers<[1], [0], [0], [1], [0, 0, 1, 1], [], []>} : vector<8x32xbf16>, vector<32x32xbf16>, vector<8x32xf32> -> vector<8x32xf32>
    %48 = arith.addf %43, %47 : vector<8x32xf32>
    %c7_i32 = arith.constant 7 : i32
    %49 = tpu.dynamic_rotate %7 by %c7_i32 dim 0 : vector<8x32xf32>, i32 -> vector<8x32xf32>
    %c1_i32_30 = arith.constant 1 : i32
    %50 = vector.broadcast %c1_i32_30 : i32 to vector<8x32xi32>
    %51 = arith.addi %27, %50 : vector<8x32xi32>
    %c0_i32_31 = arith.constant 0 : i32
    %52 = vector.broadcast %c0_i32_31 : i32 to vector<8x32xi32>
    %53 = arith.cmpi sge, %51, %52 : vector<8x32xi32>
    %c1_i32_32 = arith.constant 1 : i32
    %54 = vector.broadcast %c1_i32_32 : i32 to vector<8x32xi32>
    %55 = arith.addi %27, %54 : vector<8x32xi32>
    %c8_i32_33 = arith.constant 8 : i32
    %56 = vector.broadcast %c8_i32_33 : i32 to vector<8x32xi32>
    %57 = arith.cmpi slt, %55, %56 : vector<8x32xi32>
    %58 = arith.andi %53, %57 : vector<8x32xi1>
    %cst_34 = arith.constant 0.000000e+00 : f32
    %59 = vector.broadcast %cst_34 : f32 to vector<8x32xf32>
    %60 = arith.select %58, %49, %59 : vector<8x32xi1>, vector<8x32xf32>
    %c2 = arith.constant 2 : index
    %c0_35 = arith.constant 0 : index
    %c0_36 = arith.constant 0 : index
    %61 = vector.load %arg10[%c2, %c0_35, %c0_36] : memref<3x32x32xbf16, #tpu.memory_space<vmem>>, vector<1x32x32xbf16>
    %62 = vector.shape_cast %61 : vector<1x32x32xbf16> to vector<32x32xbf16>
    %63 = arith.truncf %60 : vector<8x32xf32> to vector<8x32xbf16>
    %cst_37 = arith.constant dense<0.000000e+00> : vector<8x32xf32>
    %64 = tpu.matmul %63, %62, %cst_37 {dimension_numbers = #tpu.dot_dimension_numbers<[1], [0], [0], [1], [0, 0, 1, 1], [], []>} : vector<8x32xbf16>, vector<32x32xbf16>, vector<8x32xf32> -> vector<8x32xf32>
    %65 = arith.addf %48, %64 : vector<8x32xf32>
    %c0_38 = arith.constant 0 : index
    %c0_39 = arith.constant 0 : index
    %66 = vector.load %arg11[%c0_38, %c0_39] : memref<1x32xf32, #tpu.memory_space<vmem>>, vector<1x32xf32>
    %67 = vector.broadcast %66 : vector<1x32xf32> to vector<8x32xf32>
    %68 = arith.addf %65, %67 : vector<8x32xf32>
    %cst_40 = arith.constant 0.000000e+00 : f32
    %69 = vector.broadcast %cst_40 : f32 to vector<8x32xf32>
    %70 = arith.subf %69, %68 : vector<8x32xf32>
    %71 = math.exp %70 : vector<8x32xf32>
    %cst_41 = arith.constant 1.000000e+00 : f32
    %72 = vector.broadcast %cst_41 : f32 to vector<8x32xf32>
    %73 = arith.addf %72, %71 : vector<8x32xf32>
    %74 = tpu.reciprocal %73 {approx = true} : vector<8x32xf32> -> vector<8x32xf32>
    %75 = arith.mulf %68, %74 : vector<8x32xf32>
    %c0_42 = arith.constant 0 : index
    %c0_43 = arith.constant 0 : index
    %76 = vector.load %arg12[%c0_42, %c0_43] : memref<32x32xbf16, #tpu.memory_space<vmem>>, vector<32x32xbf16>
    %77 = arith.truncf %75 : vector<8x32xf32> to vector<8x32xbf16>
    %cst_44 = arith.constant dense<0.000000e+00> : vector<8x32xf32>
    %78 = tpu.matmul %77, %76, %cst_44 {dimension_numbers = #tpu.dot_dimension_numbers<[1], [0], [0], [1], [0, 0, 1, 1], [], []>} : vector<8x32xbf16>, vector<32x32xbf16>, vector<8x32xf32> -> vector<8x32xf32>
    %cst_45 = arith.constant 0.176776692 : f32
    %79 = vector.broadcast %cst_45 : f32 to vector<8x32xf32>
    %80 = arith.mulf %78, %79 : vector<8x32xf32>
    %81 = vector.shape_cast %80 : vector<8x32xf32> to vector<1x8x32xf32>
    %cst_46 = arith.constant dense<0xFF800000> : vector<1x32xf32>
    %82 = vector.multi_reduction <maximumf>, %81, %cst_46 [1] : vector<1x8x32xf32> to vector<1x32xf32>
    %83 = vector.shape_cast %82 : vector<1x32xf32> to vector<1x1x32xf32>
    %84 = vector.broadcast %83 : vector<1x1x32xf32> to vector<1x8x32xf32>
    %85 = arith.subf %81, %84 : vector<1x8x32xf32>
    %86 = math.exp %85 : vector<1x8x32xf32>
    %cst_47 = arith.constant dense<0.000000e+00> : vector<1x32xf32>
    %87 = vector.multi_reduction <add>, %86, %cst_47 [1] : vector<1x8x32xf32> to vector<1x32xf32>
    %88 = vector.shape_cast %87 : vector<1x32xf32> to vector<1x1x32xf32>
    %89 = tpu.reciprocal %88 {approx = true} : vector<1x1x32xf32> -> vector<1x1x32xf32>
    %90 = vector.broadcast %89 : vector<1x1x32xf32> to vector<1x8x32xf32>
    %91 = arith.mulf %86, %90 : vector<1x8x32xf32>
    %92 = vector.shape_cast %7 : vector<8x32xf32> to vector<1x8x32xf32>
    %93 = arith.mulf %92, %91 : vector<1x8x32xf32>
    %cst_48 = arith.constant dense<0.000000e+00> : vector<1x32xf32>
    %94 = vector.multi_reduction <add>, %93, %cst_48 [1] : vector<1x8x32xf32> to vector<1x32xf32>
    %95 = vector.shape_cast %94 : vector<1x32xf32> to vector<1x1x32xf32>
    %96 = vector.shape_cast %13 : vector<8x32xf32> to vector<1x8x32xf32>
    %97 = vector.broadcast %95 : vector<1x1x32xf32> to vector<1x8x32xf32>
    %98 = arith.mulf %96, %97 : vector<1x8x32xf32>
    %99 = vector.shape_cast %98 : vector<1x8x32xf32> to vector<8x32xf32>
    %c0_49 = arith.constant 0 : index
    %c0_50 = arith.constant 0 : index
    %100 = vector.load %arg22[%c0_49, %c0_50] : memref<1x32xf32, #tpu.memory_space<vmem>>, vector<1x32xf32>
    %c0_51 = arith.constant 0 : index
    %c0_52 = arith.constant 0 : index
    %101 = vector.load %arg13[%c0_51, %c0_52] : memref<32x32xbf16, #tpu.memory_space<vmem>>, vector<32x32xbf16>
    %102 = arith.truncf %99 : vector<8x32xf32> to vector<8x32xbf16>
    %cst_53 = arith.constant dense<0.000000e+00> : vector<8x32xf32>
    %103 = tpu.matmul %102, %101, %cst_53 {dimension_numbers = #tpu.dot_dimension_numbers<[1], [0], [0], [1], [0, 0, 1, 1], [], []>} : vector<8x32xbf16>, vector<32x32xbf16>, vector<8x32xf32> -> vector<8x32xf32>
    %c0_54 = arith.constant 0 : index
    %c0_55 = arith.constant 0 : index
    %104 = vector.load %arg15[%c0_54, %c0_55] : memref<1x32xf32, #tpu.memory_space<vmem>>, vector<1x32xf32>
    %105 = vector.broadcast %104 : vector<1x32xf32> to vector<8x32xf32>
    %106 = arith.addf %103, %105 : vector<8x32xf32>
    %107 = vector.broadcast %100 : vector<1x32xf32> to vector<8x32xf32>
    %108 = arith.mulf %107, %106 : vector<8x32xf32>
    %c0_56 = arith.constant 0 : index
    %c0_57 = arith.constant 0 : index
    %109 = vector.load %arg14[%c0_56, %c0_57] : memref<32x32xbf16, #tpu.memory_space<vmem>>, vector<32x32xbf16>
    %110 = arith.truncf %99 : vector<8x32xf32> to vector<8x32xbf16>
    %cst_58 = arith.constant dense<0.000000e+00> : vector<8x32xf32>
    %111 = tpu.matmul %110, %109, %cst_58 {dimension_numbers = #tpu.dot_dimension_numbers<[1], [0], [0], [1], [0, 0, 1, 1], [], []>} : vector<8x32xbf16>, vector<32x32xbf16>, vector<8x32xf32> -> vector<8x32xf32>
    %c0_59 = arith.constant 0 : index
    %c0_60 = arith.constant 0 : index
    %112 = vector.load %arg16[%c0_59, %c0_60] : memref<1x32xf32, #tpu.memory_space<vmem>>, vector<1x32xf32>
    %113 = vector.broadcast %112 : vector<1x32xf32> to vector<8x32xf32>
    %114 = arith.addf %111, %113 : vector<8x32xf32>
    %115 = vector.broadcast %100 : vector<1x32xf32> to vector<8x32xf32>
    %116 = arith.mulf %115, %114 : vector<8x32xf32>
    %c0_61 = arith.constant 0 : index
    %c0_62 = arith.constant 0 : index
    %117 = vector.load %arg20[%c0_61, %c0_62] : memref<1x32xf32, #tpu.memory_space<vmem>>, vector<1x32xf32>
    %c0_63 = arith.constant 0 : index
    %c0_64 = arith.constant 0 : index
    %118 = vector.load %arg21[%c0_63, %c0_64] : memref<1x32xf32, #tpu.memory_space<vmem>>, vector<1x32xf32>
    %c1_i32_65 = arith.constant 1 : i32
    %119 = vector.broadcast %c1_i32_65 : i32 to vector<8x32xi32>
    %120 = arith.cmpi sge, %27, %119 : vector<8x32xi32>
    %c1_i32_66 = arith.constant 1 : i32
    %121 = tpu.dynamic_rotate %108 by %c1_i32_66 dim 0 : vector<8x32xf32>, i32 -> vector<8x32xf32>
    %cst_67 = arith.constant 0.000000e+00 : f32
    %122 = vector.broadcast %cst_67 : f32 to vector<8x32xf32>
    %123 = arith.select %120, %121, %122 : vector<8x32xi1>, vector<8x32xf32>
    %c1_i32_68 = arith.constant 1 : i32
    %124 = tpu.dynamic_rotate %116 by %c1_i32_68 dim 0 : vector<8x32xf32>, i32 -> vector<8x32xf32>
    %cst_69 = arith.constant 0.000000e+00 : f32
    %125 = vector.broadcast %cst_69 : f32 to vector<8x32xf32>
    %126 = arith.select %120, %124, %125 : vector<8x32xi1>, vector<8x32xf32>
    %127 = vector.broadcast %117 : vector<1x32xf32> to vector<8x32xf32>
    %128 = arith.mulf %127, %123 : vector<8x32xf32>
    %129 = arith.addf %108, %128 : vector<8x32xf32>
    %130 = vector.broadcast %118 : vector<1x32xf32> to vector<8x32xf32>
    %131 = arith.mulf %130, %126 : vector<8x32xf32>
    %132 = arith.subf %129, %131 : vector<8x32xf32>
    %133 = vector.broadcast %117 : vector<1x32xf32> to vector<8x32xf32>
    %134 = arith.mulf %133, %126 : vector<8x32xf32>
    %135 = arith.addf %116, %134 : vector<8x32xf32>
    %136 = vector.broadcast %118 : vector<1x32xf32> to vector<8x32xf32>
    %137 = arith.mulf %136, %123 : vector<8x32xf32>
    %138 = arith.addf %135, %137 : vector<8x32xf32>
    %139 = arith.mulf %117, %117 : vector<1x32xf32>
    %140 = arith.mulf %118, %118 : vector<1x32xf32>
    %141 = arith.subf %139, %140 : vector<1x32xf32>
    %cst_70 = arith.constant 2.000000e+00 : f32
    %142 = vector.broadcast %cst_70 : f32 to vector<1x32xf32>
    %143 = arith.mulf %142, %117 : vector<1x32xf32>
    %144 = arith.mulf %143, %118 : vector<1x32xf32>
    %c2_i32 = arith.constant 2 : i32
    %145 = vector.broadcast %c2_i32 : i32 to vector<8x32xi32>
    %146 = arith.cmpi sge, %27, %145 : vector<8x32xi32>
    %c2_i32_71 = arith.constant 2 : i32
    %147 = tpu.dynamic_rotate %132 by %c2_i32_71 dim 0 : vector<8x32xf32>, i32 -> vector<8x32xf32>
    %cst_72 = arith.constant 0.000000e+00 : f32
    %148 = vector.broadcast %cst_72 : f32 to vector<8x32xf32>
    %149 = arith.select %146, %147, %148 : vector<8x32xi1>, vector<8x32xf32>
    %c2_i32_73 = arith.constant 2 : i32
    %150 = tpu.dynamic_rotate %138 by %c2_i32_73 dim 0 : vector<8x32xf32>, i32 -> vector<8x32xf32>
    %cst_74 = arith.constant 0.000000e+00 : f32
    %151 = vector.broadcast %cst_74 : f32 to vector<8x32xf32>
    %152 = arith.select %146, %150, %151 : vector<8x32xi1>, vector<8x32xf32>
    %153 = vector.broadcast %141 : vector<1x32xf32> to vector<8x32xf32>
    %154 = arith.mulf %153, %149 : vector<8x32xf32>
    %155 = arith.addf %132, %154 : vector<8x32xf32>
    %156 = vector.broadcast %144 : vector<1x32xf32> to vector<8x32xf32>
    %157 = arith.mulf %156, %152 : vector<8x32xf32>
    %158 = arith.subf %155, %157 : vector<8x32xf32>
    %159 = vector.broadcast %141 : vector<1x32xf32> to vector<8x32xf32>
    %160 = arith.mulf %159, %152 : vector<8x32xf32>
    %161 = arith.addf %138, %160 : vector<8x32xf32>
    %162 = vector.broadcast %144 : vector<1x32xf32> to vector<8x32xf32>
    %163 = arith.mulf %162, %149 : vector<8x32xf32>
    %164 = arith.addf %161, %163 : vector<8x32xf32>
    %165 = arith.mulf %141, %141 : vector<1x32xf32>
    %166 = arith.mulf %144, %144 : vector<1x32xf32>
    %167 = arith.subf %165, %166 : vector<1x32xf32>
    %cst_75 = arith.constant 2.000000e+00 : f32
    %168 = vector.broadcast %cst_75 : f32 to vector<1x32xf32>
    %169 = arith.mulf %168, %141 : vector<1x32xf32>
    %170 = arith.mulf %169, %144 : vector<1x32xf32>
    %c4_i32 = arith.constant 4 : i32
    %171 = vector.broadcast %c4_i32 : i32 to vector<8x32xi32>
    %172 = arith.cmpi sge, %27, %171 : vector<8x32xi32>
    %c4_i32_76 = arith.constant 4 : i32
    %173 = tpu.dynamic_rotate %158 by %c4_i32_76 dim 0 : vector<8x32xf32>, i32 -> vector<8x32xf32>
    %cst_77 = arith.constant 0.000000e+00 : f32
    %174 = vector.broadcast %cst_77 : f32 to vector<8x32xf32>
    %175 = arith.select %172, %173, %174 : vector<8x32xi1>, vector<8x32xf32>
    %c4_i32_78 = arith.constant 4 : i32
    %176 = tpu.dynamic_rotate %164 by %c4_i32_78 dim 0 : vector<8x32xf32>, i32 -> vector<8x32xf32>
    %cst_79 = arith.constant 0.000000e+00 : f32
    %177 = vector.broadcast %cst_79 : f32 to vector<8x32xf32>
    %178 = arith.select %172, %176, %177 : vector<8x32xi1>, vector<8x32xf32>
    %179 = vector.broadcast %167 : vector<1x32xf32> to vector<8x32xf32>
    %180 = arith.mulf %179, %175 : vector<8x32xf32>
    %181 = arith.addf %158, %180 : vector<8x32xf32>
    %182 = vector.broadcast %170 : vector<1x32xf32> to vector<8x32xf32>
    %183 = arith.mulf %182, %178 : vector<8x32xf32>
    %184 = arith.subf %181, %183 : vector<8x32xf32>
    %185 = vector.broadcast %167 : vector<1x32xf32> to vector<8x32xf32>
    %186 = arith.mulf %185, %178 : vector<8x32xf32>
    %187 = arith.addf %164, %186 : vector<8x32xf32>
    %188 = vector.broadcast %170 : vector<1x32xf32> to vector<8x32xf32>
    %189 = arith.mulf %188, %175 : vector<8x32xf32>
    %190 = arith.addf %187, %189 : vector<8x32xf32>
    %cst_80 = arith.constant 0.000000e+00 : f32
    %191 = vector.broadcast %cst_80 : f32 to vector<8x32xf32>
    %192 = arith.subf %191, %19 : vector<8x32xf32>
    %193 = math.exp %192 : vector<8x32xf32>
    %cst_81 = arith.constant 1.000000e+00 : f32
    %194 = vector.broadcast %cst_81 : f32 to vector<8x32xf32>
    %195 = arith.addf %194, %193 : vector<8x32xf32>
    %196 = tpu.reciprocal %195 {approx = true} : vector<8x32xf32> -> vector<8x32xf32>
    %197 = arith.mulf %19, %196 : vector<8x32xf32>
    %198 = arith.mulf %184, %197 : vector<8x32xf32>
    %cst_82 = arith.constant 0.000000e+00 : f32
    %199 = vector.broadcast %cst_82 : f32 to vector<8x32xf32>
    %200 = arith.subf %199, %25 : vector<8x32xf32>
    %201 = math.exp %200 : vector<8x32xf32>
    %cst_83 = arith.constant 1.000000e+00 : f32
    %202 = vector.broadcast %cst_83 : f32 to vector<8x32xf32>
    %203 = arith.addf %202, %201 : vector<8x32xf32>
    %204 = tpu.reciprocal %203 {approx = true} : vector<8x32xf32> -> vector<8x32xf32>
    %205 = arith.mulf %25, %204 : vector<8x32xf32>
    %206 = arith.mulf %190, %205 : vector<8x32xf32>
    %207 = arith.mulf %198, %198 : vector<8x32xf32>
    %cst_84 = arith.constant dense<0.000000e+00> : vector<8xf32>
    %208 = vector.multi_reduction <add>, %207, %cst_84 [1] : vector<8x32xf32> to vector<8xf32>
    %209 = vector.shape_cast %208 : vector<8xf32> to vector<8x1xf32>
    %210 = arith.mulf %206, %206 : vector<8x32xf32>
    %cst_85 = arith.constant dense<0.000000e+00> : vector<8xf32>
    %211 = vector.multi_reduction <add>, %210, %cst_85 [1] : vector<8x32xf32> to vector<8xf32>
    %212 = vector.shape_cast %211 : vector<8xf32> to vector<8x1xf32>
    %213 = arith.addf %209, %212 : vector<8x1xf32>
    %cst_86 = arith.constant 1.562500e-02 : f32
    %214 = vector.broadcast %cst_86 : f32 to vector<8x1xf32>
    %215 = arith.mulf %213, %214 : vector<8x1xf32>
    %cst_87 = arith.constant 9.99999974E-6 : f32
    %216 = vector.broadcast %cst_87 : f32 to vector<8x1xf32>
    %217 = arith.addf %215, %216 : vector<8x1xf32>
    %218 = math.rsqrt %217 : vector<8x1xf32>
    %219 = vector.broadcast %218 : vector<8x1xf32> to vector<8x32xf32>
    %220 = arith.mulf %198, %219 : vector<8x32xf32>
    %221 = vector.broadcast %218 : vector<8x1xf32> to vector<8x32xf32>
    %222 = arith.mulf %206, %221 : vector<8x32xf32>
    %c0_88 = arith.constant 0 : index
    %c0_89 = arith.constant 0 : index
    %223 = vector.load %arg17[%c0_88, %c0_89] : memref<32x32xbf16, #tpu.memory_space<vmem>>, vector<32x32xbf16>
    %224 = arith.truncf %220 : vector<8x32xf32> to vector<8x32xbf16>
    %cst_90 = arith.constant dense<0.000000e+00> : vector<8x32xf32>
    %225 = tpu.matmul %224, %223, %cst_90 {dimension_numbers = #tpu.dot_dimension_numbers<[1], [0], [0], [1], [0, 0, 1, 1], [], []>} : vector<8x32xbf16>, vector<32x32xbf16>, vector<8x32xf32> -> vector<8x32xf32>
    %c0_91 = arith.constant 0 : index
    %c0_92 = arith.constant 0 : index
    %226 = vector.load %arg18[%c0_91, %c0_92] : memref<32x32xbf16, #tpu.memory_space<vmem>>, vector<32x32xbf16>
    %227 = arith.truncf %222 : vector<8x32xf32> to vector<8x32xbf16>
    %cst_93 = arith.constant dense<0.000000e+00> : vector<8x32xf32>
    %228 = tpu.matmul %227, %226, %cst_93 {dimension_numbers = #tpu.dot_dimension_numbers<[1], [0], [0], [1], [0, 0, 1, 1], [], []>} : vector<8x32xbf16>, vector<32x32xbf16>, vector<8x32xf32> -> vector<8x32xf32>
    %229 = arith.addf %225, %228 : vector<8x32xf32>
    %c0_94 = arith.constant 0 : index
    %c0_95 = arith.constant 0 : index
    %230 = vector.load %arg19[%c0_94, %c0_95] : memref<1x32xf32, #tpu.memory_space<vmem>>, vector<1x32xf32>
    %231 = vector.broadcast %230 : vector<1x32xf32> to vector<8x32xf32>
    %232 = arith.addf %229, %231 : vector<8x32xf32>
    %233 = vector.shape_cast %232 : vector<8x32xf32> to vector<1x8x32xf32>
    %c0_96 = arith.constant 0 : index
    %c0_97 = arith.constant 0 : index
    %c0_98 = arith.constant 0 : index
    %234 = vector.load %arg23[%c0_96, %c0_97, %c0_98] : memref<1x8x32xf32, #tpu.memory_space<vmem>>, vector<1x8x32xf32>
    tpu.vector_store %arg23[%c0_96, %c0_97, %c0_98], %233 {strides = array<i32>} : memref<1x8x32xf32, #tpu.memory_space<vmem>>, vector<1x8x32xf32>,
    return
  }
  func.func @transform_0(%arg0: i32) -> (i32, i32, i32) {
    %c0_i32 = arith.constant 0 : i32
    %c0_i32_0 = arith.constant 0 : i32
    %c0_i32_1 = arith.constant 0 : i32
    return %arg0, %c0_i32, %c0_i32_0 : i32, i32, i32
  }
  func.func @transform_1(%arg0: i32) -> (i32, i32) {
    %c0_i32 = arith.constant 0 : i32
    %c0_i32_0 = arith.constant 0 : i32
    %c0_i32_1 = arith.constant 0 : i32
    return %c0_i32, %c0_i32_0 : i32, i32
  }
  func.func @transform_2(%arg0: i32) -> (i32, i32) {
    %c0_i32 = arith.constant 0 : i32
    %c0_i32_0 = arith.constant 0 : i32
    %c0_i32_1 = arith.constant 0 : i32
    return %c0_i32, %c0_i32_0 : i32, i32
  }
  func.func @transform_3(%arg0: i32) -> (i32, i32) {
    %c0_i32 = arith.constant 0 : i32
    %c0_i32_0 = arith.constant 0 : i32
    %c0_i32_1 = arith.constant 0 : i32
    return %c0_i32, %c0_i32_0 : i32, i32
  }
  func.func @transform_4(%arg0: i32) -> (i32, i32) {
    %c0_i32 = arith.constant 0 : i32
    %c0_i32_0 = arith.constant 0 : i32
    %c0_i32_1 = arith.constant 0 : i32
    return %c0_i32, %c0_i32_0 : i32, i32
  }
  func.func @transform_5(%arg0: i32) -> (i32, i32) {
    %c0_i32 = arith.constant 0 : i32
    %c0_i32_0 = arith.constant 0 : i32
    %c0_i32_1 = arith.constant 0 : i32
    return %c0_i32, %c0_i32_0 : i32, i32
  }
  func.func @transform_6(%arg0: i32) -> (i32, i32) {
    %c0_i32 = arith.constant 0 : i32
    %c0_i32_0 = arith.constant 0 : i32
    %c0_i32_1 = arith.constant 0 : i32
    return %c0_i32, %c0_i32_0 : i32, i32
  }
  func.func @transform_7(%arg0: i32) -> (i32, i32) {
    %c0_i32 = arith.constant 0 : i32
    %c0_i32_0 = arith.constant 0 : i32
    %c0_i32_1 = arith.constant 0 : i32
    return %c0_i32, %c0_i32_0 : i32, i32
  }
  func.func @transform_8(%arg0: i32) -> (i32, i32) {
    %c0_i32 = arith.constant 0 : i32
    %c0_i32_0 = arith.constant 0 : i32
    %c0_i32_1 = arith.constant 0 : i32
    return %c0_i32, %c0_i32_0 : i32, i32
  }
  func.func @transform_9(%arg0: i32) -> (i32, i32, i32) {
    %c0_i32 = arith.constant 0 : i32
    %c0_i32_0 = arith.constant 0 : i32
    %c0_i32_1 = arith.constant 0 : i32
    %c0_i32_2 = arith.constant 0 : i32
    return %c0_i32, %c0_i32_0, %c0_i32_1 : i32, i32, i32
  }
  func.func @transform_10(%arg0: i32) -> (i32, i32) {
    %c0_i32 = arith.constant 0 : i32
    %c0_i32_0 = arith.constant 0 : i32
    %c0_i32_1 = arith.constant 0 : i32
    return %c0_i32, %c0_i32_0 : i32, i32
  }
  func.func @transform_11(%arg0: i32) -> (i32, i32) {
    %c0_i32 = arith.constant 0 : i32
    %c0_i32_0 = arith.constant 0 : i32
    %c0_i32_1 = arith.constant 0 : i32
    return %c0_i32, %c0_i32_0 : i32, i32
  }
  func.func @transform_12(%arg0: i32) -> (i32, i32) {
    %c0_i32 = arith.constant 0 : i32
    %c0_i32_0 = arith.constant 0 : i32
    %c0_i32_1 = arith.constant 0 : i32
    return %c0_i32, %c0_i32_0 : i32, i32
  }
  func.func @transform_13(%arg0: i32) -> (i32, i32) {
    %c0_i32 = arith.constant 0 : i32
    %c0_i32_0 = arith.constant 0 : i32
    %c0_i32_1 = arith.constant 0 : i32
    return %c0_i32, %c0_i32_0 : i32, i32
  }
  func.func @transform_14(%arg0: i32) -> (i32, i32) {
    %c0_i32 = arith.constant 0 : i32
    %c0_i32_0 = arith.constant 0 : i32
    %c0_i32_1 = arith.constant 0 : i32
    return %c0_i32, %c0_i32_0 : i32, i32
  }
  func.func @transform_15(%arg0: i32) -> (i32, i32) {
    %c0_i32 = arith.constant 0 : i32
    %c0_i32_0 = arith.constant 0 : i32
    %c0_i32_1 = arith.constant 0 : i32
    return %c0_i32, %c0_i32_0 : i32, i32
  }
  func.func @transform_16(%arg0: i32) -> (i32, i32) {
    %c0_i32 = arith.constant 0 : i32
    %c0_i32_0 = arith.constant 0 : i32
    %c0_i32_1 = arith.constant 0 : i32
    return %c0_i32, %c0_i32_0 : i32, i32
  }
  func.func @transform_17(%arg0: i32) -> (i32, i32) {
    %c0_i32 = arith.constant 0 : i32
    %c0_i32_0 = arith.constant 0 : i32
    %c0_i32_1 = arith.constant 0 : i32
    return %c0_i32, %c0_i32_0 : i32, i32
  }
  func.func @transform_18(%arg0: i32) -> (i32, i32) {
    %c0_i32 = arith.constant 0 : i32
    %c0_i32_0 = arith.constant 0 : i32
    %c0_i32_1 = arith.constant 0 : i32
    return %c0_i32, %c0_i32_0 : i32, i32
  }
  func.func @transform_19(%arg0: i32) -> (i32, i32) {
    %c0_i32 = arith.constant 0 : i32
    %c0_i32_0 = arith.constant 0 : i32
    %c0_i32_1 = arith.constant 0 : i32
    return %c0_i32, %c0_i32_0 : i32, i32
  }
  func.func @transform_20(%arg0: i32) -> (i32, i32) {
    %c0_i32 = arith.constant 0 : i32
    %c0_i32_0 = arith.constant 0 : i32
    %c0_i32_1 = arith.constant 0 : i32
    return %c0_i32, %c0_i32_0 : i32, i32
  }
  func.func @transform_21(%arg0: i32) -> (i32, i32) {
    %c0_i32 = arith.constant 0 : i32
    %c0_i32_0 = arith.constant 0 : i32
    %c0_i32_1 = arith.constant 0 : i32
    return %c0_i32, %c0_i32_0 : i32, i32
  }
  func.func @transform_22(%arg0: i32) -> (i32, i32, i32) {
    %c0_i32 = arith.constant 0 : i32
    %c0_i32_0 = arith.constant 0 : i32
    %c0_i32_1 = arith.constant 0 : i32
    return %arg0, %c0_i32, %c0_i32_0 : i32, i32, i32
  }
}

</mosaic_0001>

<bundles_post_ra>
// kernel: tpu_custom_call.1
= control target key start
LH: loop header
LB: loop body
LE: loop exit
PB: predicated region body
PF: predicated region fallthrough
CT: control target
= control target key end

     0   :  { %s3707_s0 = inlined_call_operand.hbm [shape: f32[2,8,32], index: 0, kind: input, shape index: {}]   ;;  %s3708_s1 = inlined_call_operand.hbm [shape: bf16[32,32], index: 1, kind: input, shape index: {}]   ;;  %s3709_s2 = inlined_call_operand.hbm [shape: bf16[32,32], index: 2, kind: input, shape index: {}]   ;;  %s3710_s3 = inlined_call_operand.hbm [shape: bf16[32,32], index: 3, kind: input, shape index: {}]   ;;  %s3711_s4 = inlined_call_operand.hbm [shape: bf16[32,32], index: 4, kind: input, shape index: {}]   ;;  %s3712_s5 = inlined_call_operand.hbm [shape: f32[1,32], index: 5, kind: input, shape index: {}]   ;;  %s3713_s6 = inlined_call_operand.hbm [shape: f32[1,32], index: 6, kind: input, shape index: {}]   ;;  %s3714_s7 = inlined_call_operand.hbm [shape: f32[1,32], index: 7, kind: input, shape index: {}]   ;;  %s3715_s8 = inlined_call_operand.hbm [shape: f32[1,32], index: 8, kind: input, shape index: {}]   ;;  %s3716_s9 = inlined_call_operand.hbm [shape: bf16[3,32,32], index: 9, kind: input, shape index: {}]   ;;  %s3717_s10 = inlined_call_operand.hbm [shape: f32[1,32], index: 10, kind: input, shape index: {}]   ;;  %s3718_s11 = inlined_call_operand.vmem [shape: bf16[32,32], index: 11, kind: input, shape index: {}]   ;;  %s3719_s12 = inlined_call_operand.vmem [shape: bf16[32,32], index: 12, kind: input, shape index: {}]   ;;  %s3720_s13 = inlined_call_operand.vmem [shape: bf16[32,32], index: 13, kind: input, shape index: {}]   ;;  %s3721_s14 = inlined_call_operand.hbm [shape: f32[1,32], index: 14, kind: input, shape index: {}]   ;;  %s3722_s15 = inlined_call_operand.hbm [shape: f32[1,32], index: 15, kind: input, shape index: {}]   ;;  %s3723_s16 = inlined_call_operand.hbm [shape: bf16[32,32], index: 16, kind: input, shape index: {}]   ;;  %s3724_s17 = inlined_call_operand.vmem [shape: bf16[32,32], index: 17, kind: input, shape index: {}]   ;;  %s3725_s18 = inlined_call_operand.vmem [shape: f32[1,32], index: 18, kind: input, shape index: {}]   ;;  %s3726_s19 = inlined_call_operand.vmem [shape: f32[1,32], index: 19, kind: input, shape index: {}]   ;;  %s3727_s20 = inlined_call_operand.vmem [shape: f32[1,32], index: 20, kind: input, shape index: {}]   ;;  %s3728_s21 = inlined_call_operand.vmem [shape: f32[1,32], index: 21, kind: input, shape index: {}]   ;;  %s3729_s22 = inlined_call_operand.hbm [shape: f32[2,8,32], index: 22, kind: output, shape index: {}]  }
   0x1   :  { %3752 = sst [smem:[#allocation35_spill]] %s3707_s0 }
   0x2   :  { %3753 = sst [smem:[#allocation36_spill]] %s3708_s1 }
   0x3   :  { %3754 = sst [smem:[#allocation37_spill]] %s3709_s2 }
   0x4   :  { %3755 = sst [smem:[#allocation38_spill]] %s3710_s3 }
   0x5   :  { %3756 = sst [smem:[#allocation39_spill]] %s3711_s4 }
   0x6   :  { %3757 = sst [smem:[#allocation40_spill]] %s3712_s5 }
   0x7   :  { %3758 = sst [smem:[#allocation41_spill]] %s3713_s6 }
   0x8   :  { %3759 = sst [smem:[#allocation42_spill]] %s3714_s7 }
   0x9   :  { %3760 = sst [smem:[#allocation43_spill]] %s3715_s8 }
   0xa   :  { %3761 = sst [smem:[#allocation44_spill]] %s3716_s9 }
   0xb   :  { %3762 = sst [smem:[#allocation45_spill]] %s3717_s10 }
   0xc   :  { %3763 = sst [smem:[#allocation46_spill]] %s3718_s11 }
   0xd   :  { %3764 = sst [smem:[#allocation47_spill]] %s3719_s12 }
   0xe   :  { %3765 = sst [smem:[#allocation48_spill]] %s3720_s13 }
   0xf   :  { %3766 = sst [smem:[#allocation49_spill]] %s3721_s14 }
  0x10   :  { %3767 = sst [smem:[#allocation50_spill]] %s3724_s17 }
  0x11   :  { %3768 = sst [smem:[#allocation51_spill]] %s3725_s18 }
  0x12   :  { %3769 = sst [smem:[#allocation52_spill]] %s3726_s19 }
  0x13   :  { %3770 = sst [smem:[#allocation53_spill]] %s3727_s20 }
  0x14   :  { %3771 = sst [smem:[#allocation54_spill]] %s3728_s21 }
  0x15   :  { %3772 = sst [smem:[#allocation55_spill]] %s3729_s22 }
  0x16   :  { %27 = vsyncpa [#allocation3], 0 }
  0x17   :  { %29 = vsyncpa [#allocation3 + $0x1], 0 }
  0x18   :  { %30 = vsyncpa [#allocation6], 0 }
  0x19   :  { %31 = vsyncpa [#allocation9], 0 }
  0x1a   :  { %32 = vsyncpa [#allocation12], 0 }
  0x1b   :  { %33 = vsyncpa [#allocation15], 0 }
  0x1c   :  { %34 = vsyncpa [#allocation18], 0 }
  0x1d   :  { %35 = vsyncpa [#allocation21], 0 }
  0x1e   :  { %36 = vsyncpa [#allocation24], 0 }
  0x1f   :  { %37 = vsyncpa [#allocation4], 0 }
  0x20   :  { %39 = vsyncpa [#allocation4 + $0x1], 0  ;;  %s3086_s3 = smov 0   ;;  %s3088_s28 = smov 0  }
  0x21   :  { %s3090_s29 = smov 0   ;;  %s3092_s30 = smov 0  }
  0x22 LB: > { %s2952_s4 = smov [#allocation5]   ;;  %s3107_s23 = sadd.s32 4294967295, %s2950_s30   ;;  %s2950_s30 = sphi %s3092_s30, %s3825_s30   ;;  %s2946_s29 = sphi %s3090_s29, %s3824_s29   ;;  %s2942_s28 = sphi %s3088_s28, %s3823_s28   ;;  %s2938_s3 = sphi %s3086_s3, %s3822_s3  }
  0x23   : > { %s555_s0 = sshll.u32 %s2952_s4, 4  ;;  %p2025_p0 = scmp.ge.s32.totalorder %s2950_s30, 1  ;;  %s3112_s0 = int_to_ptr.vmem [resolvable:$true] %s555_s0 }
  0x24   : > { %p3746_p1 = scmp.eq.s32.totalorder %s3107_s23, 0  ;;  %p543_p2 = scmp.lt.s32.totalorder %s2950_s30, 3 }
  0x25   : > { %s2953_s5 = smov [#allocation8]   ;;  %s2954_s25 = smov [#allocation11]  }
  0x26   : > { %p3114_p3 = pnand %p2025_p0, %p543_p2  ;;  %s581_s24 = sshll.u32 %s2953_s5, 4  ;;  %s3127_s24 = int_to_ptr.vmem [resolvable:$true] %s581_s24 }
  0x27   : > { %s608_s26 = sshll.u32 %s2954_s25, 4  ;;  %s3775_s4 = sld [smem:[#allocation36_spill]]  ;;  %s3129_s26 = int_to_ptr.vmem [resolvable:$true] %s608_s26 }
  0x28   : > { %s3773_s1 = scalar_select %p3114_p3, 1, 0 }
  0x29   : > { %p2295_p5 = pneg %p3114_p3 }
  0x2b   : > { %p3123_p6 = pnand %p2295_p5, %p3746_p1 }
  0x2d   : > { %s2462_s22 = scalar_lea.hbm %s3775_s4, 256  ;;  %p3139_p8 = pneg %p3123_p6 }
  0x2e   : > { %p2463_p7 = scmp.ne.s32.totalorder %s3775_s4, %s2462_s22  ;;  %p2469_p11 = scmp.lt.u32.totalorder %s2462_s22, %s3775_s4 }
  0x30   : > { %p2465_p9 = pnand %p3139_p8, %p2463_p7 }
  0x32   : > { %p2466_p10 = pneg %p2465_p9 }
  0x34   : > { %p2471_p12 = pnand %p2469_p11, %p2466_p10 }
  0x36   : > { %2474 = shalt.err (!%p2471_p12)
}
  0x37   : > { %s2475_s17 = scalar_lea.vmem %s3112_s0, 256  ;;  %p2483_p5 = scmp.lt.s32.totalorder %s3112_s0, %s3112_s0 }
  0x38   : > { %p2476_p13 = scmp.ne.s32.totalorder %s3112_s0, %s2475_s17  ;;  %p2484_p4 = scmp.lt.s32.totalorder %s2475_s17, %s2475_s17 }
  0x3a   : > { %p2478_p0 = pnand %p2476_p13, %p3139_p8  ;;  %p2485_p7 = por %p2484_p4, %p2483_p5 }
  0x3c   : > { %p2479_p2 = pneg %p2478_p0 }
  0x3e   : > { %p2486_p9 = pnand %p2485_p7, %p2479_p2 }
  0x40   : > { %2489 = shalt.err (!%p2486_p9)
}
  0x41   : > { %s3742_s18 = smov 64   ;;  %s3744_s20 = smov 4  }
  0x42   : > { %2298 = dma.hbm_to_vmem [thread:$0]  (!%p3123_p6), %s3775_s4, 256, %s3112_s0, [#allocation6], %s3742_s18, %s3742_s18, %s3744_s20  }
  0x43   : > { %s3777_s19 = sld [smem:[#allocation38_spill]] }
  0x49   : > { %s2490_s17 = scalar_lea.hbm %s3777_s19, 256 }
  0x4a   : > { %p2491_p4 = scmp.ne.s32.totalorder %s3777_s19, %s2490_s17  ;;  %p2497_p12 = scmp.lt.u32.totalorder %s2490_s17, %s3777_s19 }
  0x4c   : > { %p2493_p10 = pnand %p2491_p4, %p3139_p8 }
  0x4e   : > { %p2494_p11 = pneg %p2493_p10 }
  0x50   : > { %p2499_p13 = pnand %p2497_p12, %p2494_p11 }
  0x52   : > { %2502 = shalt.err (!%p2499_p13)
}
  0x53   : > { %s2503_s0 = scalar_lea.vmem %s3127_s24, 256  ;;  %p2511_p7 = scmp.lt.s32.totalorder %s3127_s24, %s3127_s24 }
  0x54   : > { %p2504_p0 = scmp.ne.s32.totalorder %s3127_s24, %s2503_s0  ;;  %p2512_p9 = scmp.lt.s32.totalorder %s2503_s0, %s2503_s0 }
  0x56   : > { %p2506_p2 = pnand %p2504_p0, %p3139_p8  ;;  %p2513_p4 = por %p2512_p9, %p2511_p7 }
  0x58   : > { %p2507_p5 = pneg %p2506_p2 }
  0x5a   : > { %p2514_p10 = pnand %p2513_p4, %p2507_p5 }
  0x5c   : > { %2517 = shalt.err (!%p2514_p10)
}
  0x5d   : > { %2304 = dma.hbm_to_vmem [thread:$0]  (!%p3123_p6), %s3777_s19, 256, %s3127_s24, [#allocation9], %s3742_s18, %s3742_s18, %s3744_s20  }
  0x5e   : > { %s3778_s22 = sld [smem:[#allocation40_spill]] }
  0x64   : > { %s2518_s2 = scalar_lea.hbm %s3778_s22, 16 }
  0x65   : > { %p2519_p11 = scmp.ne.s32.totalorder %s3778_s22, %s2518_s2  ;;  %p2525_p0 = scmp.lt.u32.totalorder %s2518_s2, %s3778_s22 }
  0x67   : > { %p2521_p12 = pnand %p2519_p11, %p3139_p8 }
  0x69   : > { %p2522_p13 = pneg %p2521_p12 }
  0x6b   : > { %p2527_p2 = pnand %p2525_p0, %p2522_p13 }
  0x6d   : > { %2530 = shalt.err (!%p2527_p2)
}
  0x6e   : > { %s2531_s24 = scalar_lea.vmem %s3129_s26, 16  ;;  %s2538_s11 = scalar_lea.vmem %s3129_s26, 32 }
  0x6f   : > { %p2532_p5 = scmp.ne.s32.totalorder %s3129_s26, %s2531_s24  ;;  %p2539_p4 = scmp.lt.s32.totalorder %s3129_s26, %s3129_s26 }
  0x70   : > { %p2540_p10 = scmp.lt.s32.totalorder %s2538_s11, %s2531_s24 }
  0x71   : > { %p2534_p7 = pnand %p2532_p5, %p3139_p8 }
  0x72   : > { %p2541_p11 = por %p2540_p10, %p2539_p4 }
  0x73   : > { %p2535_p9 = pneg %p2534_p7 }
  0x75   : > { %p2542_p12 = pnand %p2541_p11, %p2535_p9 }
  0x77   : > { %2545 = shalt.err (!%p2542_p12)
}
  0x78   : > { %2310 = dma.hbm_to_vmem [thread:$0]  (!%p3123_p6), %s3778_s22, 16, %s3129_s26, [#allocation12]  }
  0x79   : > { %s2957_s21 = smov [#allocation14]   ;;  %s2958_s27 = smov [#allocation17]  }
  0x7a   : > { %s630_s2 = sshll.u32 %s2957_s21, 4  ;;  %s651_s25 = sshll.u32 %s2958_s27, 4  ;;  %s631_s2 = int_to_ptr.vmem [resolvable:$true] %s630_s2  ;;  %s652_s25 = int_to_ptr.vmem [resolvable:$true] %s651_s25 }
  0x7b   : > { %s3779_s7 = sld [smem:[#allocation42_spill]] }
  0x81   : > { %s2546_s24 = scalar_lea.hbm %s3779_s7, 16 }
  0x82   : > { %p2547_p13 = scmp.ne.s32.totalorder %s3779_s7, %s2546_s24  ;;  %p2553_p5 = scmp.lt.u32.totalorder %s2546_s24, %s3779_s7 }
  0x84   : > { %p2549_p0 = pnand %p2547_p13, %p3139_p8 }
  0x86   : > { %p2550_p2 = pneg %p2549_p0 }
  0x88   : > { %p2555_p7 = pnand %p2553_p5, %p2550_p2 }
  0x8a   : > { %2558 = shalt.err (!%p2555_p7)
}
  0x8b   : > { %s2559_s26 = scalar_lea.vmem %s631_s2, 16  ;;  %s2566_s13 = scalar_lea.vmem %s631_s2, 32 }
  0x8c   : > { %p2560_p9 = scmp.ne.s32.totalorder %s631_s2, %s2559_s26  ;;  %p2567_p11 = scmp.lt.s32.totalorder %s631_s2, %s631_s2 }
  0x8d   : > { %p2568_p12 = scmp.lt.s32.totalorder %s2566_s13, %s2559_s26 }
  0x8e   : > { %p2562_p4 = pnand %p2560_p9, %p3139_p8 }
  0x8f   : > { %p2569_p1 = por %p2568_p12, %p2567_p11 }
  0x90   : > { %p2563_p10 = pneg %p2562_p4 }
  0x92   : > { %p2570_p3 = pnand %p2569_p1, %p2563_p10 }
  0x94   : > { %2573 = shalt.err (!%p2570_p3)
}
  0x95   : > { %2316 = dma.hbm_to_vmem [thread:$0]  (!%p3123_p6), %s3779_s7, 16, %s631_s2, [#allocation15]  }
  0x96   : > { %s3780_s9 = sld [smem:[#allocation44_spill]] }
  0x9c   : > { %s2574_s17 = scalar_lea.hbm %s3780_s9, 768 }
  0x9d   : > { %p2575_p13 = scmp.ne.s32.totalorder %s3780_s9, %s2574_s17  ;;  %p2581_p3 = scmp.lt.u32.totalorder %s2574_s17, %s3780_s9 }
  0x9f   : > { %p2577_p0 = pnand %p2575_p13, %p3139_p8 }
  0xa1   : > { %p2578_p1 = pneg %p2577_p0 }
  0xa3   : > { %p2583_p2 = pnand %p2581_p3, %p2578_p1 }
  0xa5   : > { %2586 = shalt.err (!%p2583_p2)
}
  0xa6   : > { %s2587_s26 = scalar_lea.vmem %s652_s25, 768  ;;  %p2595_p4 = scmp.lt.s32.totalorder %s652_s25, %s652_s25 }
  0xa7   : > { %p2588_p5 = scmp.ne.s32.totalorder %s652_s25, %s2587_s26  ;;  %p2596_p10 = scmp.lt.s32.totalorder %s2587_s26, %s2587_s26 }
  0xa9   : > { %p2590_p7 = pnand %p2588_p5, %p3139_p8  ;;  %p2597_p11 = por %p2596_p10, %p2595_p4 }
  0xab   : > { %p2591_p9 = pneg %p2590_p7 }
  0xad   : > { %p2598_p12 = pnand %p2597_p11, %p2591_p9 }
  0xaf   : > { %2601 = shalt.err (!%p2598_p12)
}
  0xb0   : > { %s3781_s2 = smov 4   ;;  %s3782_s13 = smov 64  }
  0xb1   : > { %2322 = dma.hbm_to_vmem [thread:$0]  (!%p3123_p6), %s3780_s9, 768, %s652_s25, [#allocation18], %s3782_s13, %s3782_s13, %s3781_s2  }
  0xb2   : > { %s2959_s20 = smov [#allocation20]   ;;  %s2960_s17 = smov [#allocation7]  }
  0xb3   : > { %s685_s27 = sshll.u32 %s2959_s20, 4  ;;  %s568_s0 = sshll.u32 %s2960_s17, 4  ;;  %s686_s27 = int_to_ptr.vmem [resolvable:$true] %s685_s27  ;;  %s569_s0 = int_to_ptr.vmem [resolvable:$true] %s568_s0 }
  0xb4   : > { %s3783_s14 = sld [smem:[#allocation49_spill]] }
  0xba   : > { %s2602_s12 = scalar_lea.hbm %s3783_s14, 16 }
  0xbb   : > { %p2603_p13 = scmp.ne.s32.totalorder %s3783_s14, %s2602_s12  ;;  %p2609_p3 = scmp.lt.u32.totalorder %s2602_s12, %s3783_s14 }
  0xbd   : > { %p2605_p0 = pnand %p2603_p13, %p3139_p8 }
  0xbf   : > { %p2606_p1 = pneg %p2605_p0 }
  0xc1   : > { %p2611_p2 = pnand %p2609_p3, %p2606_p1 }
  0xc3   : > { %2614 = shalt.err (!%p2611_p2)
}
  0xc4   : > { %s2615_s25 = scalar_lea.vmem %s686_s27, 16  ;;  %s2622_s21 = scalar_lea.vmem %s686_s27, 32 }
  0xc5   : > { %p2616_p5 = scmp.ne.s32.totalorder %s686_s27, %s2615_s25  ;;  %p2623_p4 = scmp.lt.s32.totalorder %s686_s27, %s686_s27 }
  0xc6   : > { %p2624_p10 = scmp.lt.s32.totalorder %s2622_s21, %s2615_s25 }
  0xc7   : > { %p2618_p7 = pnand %p2616_p5, %p3139_p8 }
  0xc8   : > { %p2625_p11 = por %p2624_p10, %p2623_p4 }
  0xc9   : > { %p2619_p9 = pneg %p2618_p7 }
  0xcb   : > { %p2626_p12 = pnand %p2625_p11, %p2619_p9 }
  0xcd   : > { %2629 = shalt.err (!%p2626_p12)
}
  0xce   : > { %2328 = dma.hbm_to_vmem [thread:$0]  (!%p3123_p6), %s3783_s14, 16, %s686_s27, [#allocation21]  }
  0xcf   : > { %s3784_s24 = sld [smem:[#allocation37_spill]] }
  0xd5   : > { %s2630_s11 = scalar_lea.hbm %s3784_s24, 256 }
  0xd6   : > { %p2631_p13 = scmp.ne.s32.totalorder %s3784_s24, %s2630_s11  ;;  %p2637_p3 = scmp.lt.u32.totalorder %s2630_s11, %s3784_s24 }
  0xd8   : > { %p2633_p0 = pnand %p2631_p13, %p3139_p8 }
  0xda   : > { %p2634_p1 = pneg %p2633_p0 }
  0xdc   : > { %p2639_p2 = pnand %p2637_p3, %p2634_p1 }
  0xde   : > { %2642 = shalt.err (!%p2639_p2)
}
  0xdf   : > { %s2643_s21 = scalar_lea.vmem %s569_s0, 256  ;;  %p2651_p4 = scmp.lt.s32.totalorder %s569_s0, %s569_s0 }
  0xe0   : > { %p2644_p5 = scmp.ne.s32.totalorder %s569_s0, %s2643_s21  ;;  %p2652_p10 = scmp.lt.s32.totalorder %s2643_s21, %s2643_s21 }
  0xe2   : > { %p2646_p7 = pnand %p2644_p5, %p3139_p8  ;;  %p2653_p11 = por %p2652_p10, %p2651_p4 }
  0xe4   : > { %p2647_p9 = pneg %p2646_p7 }
  0xe6   : > { %p2654_p12 = pnand %p2653_p11, %p2647_p9 }
  0xe8   : > { %2657 = shalt.err (!%p2654_p12)
}
  0xe9   : > { %2301 = dma.hbm_to_vmem [thread:$0]  (!%p3123_p6), %s3784_s24, 256, %s569_s0, [#allocation6], %s3782_s13, %s3782_s13, %s3781_s2  }
  0xea   : > { %s2961_s20 = smov [#allocation10]   ;;  %s2962_s17 = smov [#allocation13]  }
  0xeb   : > { %s594_s7 = sshll.u32 %s2961_s20, 4  ;;  %s619_s11 = sshll.u32 %s2962_s17, 4  ;;  %s595_s7 = int_to_ptr.vmem [resolvable:$true] %s594_s7  ;;  %s620_s11 = int_to_ptr.vmem [resolvable:$true] %s619_s11 }
  0xec   : > { %s3785_s18 = sld [smem:[#allocation39_spill]] }
  0xf2   : > { %s2658_s25 = scalar_lea.hbm %s3785_s18, 256 }
  0xf3   : > { %p2659_p13 = scmp.ne.s32.totalorder %s3785_s18, %s2658_s25  ;;  %p2665_p3 = scmp.lt.u32.totalorder %s2658_s25, %s3785_s18 }
  0xf5   : > { %p2661_p0 = pnand %p2659_p13, %p3139_p8 }
  0xf7   : > { %p2662_p1 = pneg %p2661_p0 }
  0xf9   : > { %p2667_p2 = pnand %p2665_p3, %p2662_p1 }
  0xfb   : > { %2670 = shalt.err (!%p2667_p2)
}
  0xfc   : > { %s2671_s0 = scalar_lea.vmem %s595_s7, 256  ;;  %p2679_p4 = scmp.lt.s32.totalorder %s595_s7, %s595_s7 }
  0xfd   : > { %p2672_p5 = scmp.ne.s32.totalorder %s595_s7, %s2671_s0  ;;  %p2680_p10 = scmp.lt.s32.totalorder %s2671_s0, %s2671_s0 }
  0xff   : > { %p2674_p7 = pnand %p2672_p5, %p3139_p8  ;;  %p2681_p11 = por %p2680_p10, %p2679_p4 }
 0x101   : > { %p2675_p9 = pneg %p2674_p7 }
 0x103   : > { %p2682_p12 = pnand %p2681_p11, %p2675_p9 }
 0x105   : > { %2685 = shalt.err (!%p2682_p12)
}
 0x106   : > { %2307 = dma.hbm_to_vmem [thread:$0]  (!%p3123_p6), %s3785_s18, 256, %s595_s7, [#allocation9], %s3782_s13, %s3782_s13, %s3781_s2  }
 0x107   : > { %s3786_s17 = sld [smem:[#allocation41_spill]] }
 0x10d   : > { %s2686_s12 = scalar_lea.hbm %s3786_s17, 16 }
 0x10e   : > { %p2687_p13 = scmp.ne.s32.totalorder %s3786_s17, %s2686_s12  ;;  %p2693_p3 = scmp.lt.u32.totalorder %s2686_s12, %s3786_s17 }
 0x110   : > { %p2689_p0 = pnand %p2687_p13, %p3139_p8 }
 0x112   : > { %p2690_p1 = pneg %p2689_p0 }
 0x114   : > { %p2695_p2 = pnand %p2693_p3, %p2690_p1 }
 0x116   : > { %2698 = shalt.err (!%p2695_p2)
}
 0x117   : > { %s2699_s0 = scalar_lea.vmem %s620_s11, 16  ;;  %s2706_s7 = scalar_lea.vmem %s620_s11, 32 }
 0x118   : > { %p2700_p5 = scmp.ne.s32.totalorder %s620_s11, %s2699_s0  ;;  %p2707_p4 = scmp.lt.s32.totalorder %s620_s11, %s620_s11 }
 0x119   : > { %p2708_p10 = scmp.lt.s32.totalorder %s2706_s7, %s2699_s0 }
 0x11a   : > { %p2702_p7 = pnand %p2700_p5, %p3139_p8 }
 0x11b   : > { %p2709_p11 = por %p2708_p10, %p2707_p4 }
 0x11c   : > { %p2703_p9 = pneg %p2702_p7 }
 0x11e   : > { %p2710_p12 = pnand %p2709_p11, %p2703_p9 }
 0x120   : > { %2713 = shalt.err (!%p2710_p12)
}
 0x121   : > { %2313 = dma.hbm_to_vmem [thread:$0]  (!%p3123_p6), %s3786_s17, 16, %s620_s11, [#allocation12]  }
 0x122   : > { %s2963_s4 = smov [#allocation16]   ;;  %s2964_s12 = smov [#allocation19]  }
 0x123   : > { %s641_s20 = sshll.u32 %s2963_s4, 4  ;;  %s665_s26 = sshll.u32 %s2964_s12, 4  ;;  %s642_s20 = int_to_ptr.vmem [resolvable:$true] %s641_s20  ;;  %s666_s26 = int_to_ptr.vmem [resolvable:$true] %s665_s26 }
 0x124   : > { %s3787_s8 = sld [smem:[#allocation43_spill]] }
 0x12a   : > { %s2714_s27 = scalar_lea.hbm %s3787_s8, 16 }
 0x12b   : > { %p2715_p13 = scmp.ne.s32.totalorder %s3787_s8, %s2714_s27  ;;  %p2721_p3 = scmp.lt.u32.totalorder %s2714_s27, %s3787_s8 }
 0x12d   : > { %p2717_p0 = pnand %p2715_p13, %p3139_p8 }
 0x12f   : > { %p2718_p1 = pneg %p2717_p0 }
 0x131   : > { %p2723_p2 = pnand %p2721_p3, %p2718_p1 }
 0x133   : > { %2726 = shalt.err (!%p2723_p2)
}
 0x134   : > { %s2727_s11 = scalar_lea.vmem %s642_s20, 16  ;;  %s2734_s14 = scalar_lea.vmem %s642_s20, 32 }
 0x135   : > { %p2728_p5 = scmp.ne.s32.totalorder %s642_s20, %s2727_s11  ;;  %p2735_p4 = scmp.lt.s32.totalorder %s642_s20, %s642_s20 }
 0x136   : > { %p2736_p10 = scmp.lt.s32.totalorder %s2734_s14, %s2727_s11 }
 0x137   : > { %p2730_p7 = pnand %p2728_p5, %p3139_p8 }
 0x138   : > { %p2737_p11 = por %p2736_p10, %p2735_p4 }
 0x139   : > { %p2731_p9 = pneg %p2730_p7 }
 0x13b   : > { %p2738_p12 = pnand %p2737_p11, %p2731_p9 }
 0x13d   : > { %2741 = shalt.err (!%p2738_p12)
}
 0x13e   : > { %2319 = dma.hbm_to_vmem [thread:$0]  (!%p3123_p6), %s3787_s8, 16, %s642_s20, [#allocation15]  }
 0x13f   : > { %s3788_s10 = sld [smem:[#allocation45_spill]] }
 0x145   : > { %s2742_s21 = scalar_lea.hbm %s3788_s10, 16 }
 0x146   : > { %p2743_p13 = scmp.ne.s32.totalorder %s3788_s10, %s2742_s21  ;;  %p2749_p3 = scmp.lt.u32.totalorder %s2742_s21, %s3788_s10 }
 0x148   : > { %p2745_p0 = pnand %p2743_p13, %p3139_p8 }
 0x14a   : > { %p2746_p1 = pneg %p2745_p0 }
 0x14c   : > { %p2751_p2 = pnand %p2749_p3, %p2746_p1 }
 0x14e   : > { %2754 = shalt.err (!%p2751_p2)
}
 0x14f   : > { %s2755_s11 = scalar_lea.vmem %s666_s26, 16  ;;  %s2762_s20 = scalar_lea.vmem %s666_s26, 32 }
 0x150   : > { %p2756_p5 = scmp.ne.s32.totalorder %s666_s26, %s2755_s11  ;;  %p2763_p4 = scmp.lt.s32.totalorder %s666_s26, %s666_s26 }
 0x151   : > { %p2764_p10 = scmp.lt.s32.totalorder %s2762_s20, %s2755_s11 }
 0x152   : > { %p2758_p7 = pnand %p2756_p5, %p3139_p8 }
 0x153   : > { %p2765_p11 = por %p2764_p10, %p2763_p4 }
 0x154   : > { %p2759_p9 = pneg %p2758_p7 }
 0x156   : > { %p2766_p12 = pnand %p2765_p11, %p2759_p9 }
 0x158   : > { %2769 = shalt.err (!%p2766_p12)
}
 0x159   : > { %2325 = dma.hbm_to_vmem [thread:$0]  (!%p3123_p6), %s3788_s10, 16, %s666_s26, [#allocation18]  }
 0x15a   : > { %s2965_s12 = smov [#allocation22]   ;;  %s2966_s25 = smov [#allocation23]  }
 0x15b   : > { %s696_s18 = sshll.u32 %s2965_s12, 4  ;;  %s706_s21 = sshll.u32 %s2966_s25, 4  ;;  %s697_s18 = int_to_ptr.vmem [resolvable:$true] %s696_s18  ;;  %s707_s21 = int_to_ptr.vmem [resolvable:$true] %s706_s21 }
 0x15c   : > { %s2770_s7 = scalar_lea.hbm %s3722_s15, 16 }
 0x15d   : > { %p2771_p13 = scmp.ne.s32.totalorder %s3722_s15, %s2770_s7  ;;  %p2777_p3 = scmp.lt.u32.totalorder %s2770_s7, %s3722_s15 }
 0x15f   : > { %p2773_p0 = pnand %p2771_p13, %p3139_p8 }
 0x161   : > { %p2774_p1 = pneg %p2773_p0 }
 0x163   : > { %p2779_p2 = pnand %p2777_p3, %p2774_p1 }
 0x165   : > { %2782 = shalt.err (!%p2779_p2)
}
 0x166   : > { %s2783_s26 = scalar_lea.vmem %s697_s18, 16  ;;  %s2790_s4 = scalar_lea.vmem %s697_s18, 32 }
 0x167   : > { %p2784_p5 = scmp.ne.s32.totalorder %s697_s18, %s2783_s26  ;;  %p2791_p4 = scmp.lt.s32.totalorder %s697_s18, %s697_s18 }
 0x168   : > { %p2792_p10 = scmp.lt.s32.totalorder %s2790_s4, %s2783_s26 }
 0x169   : > { %p2786_p7 = pnand %p2784_p5, %p3139_p8 }
 0x16a   : > { %p2793_p11 = por %p2792_p10, %p2791_p4 }
 0x16b   : > { %p2787_p9 = pneg %p2786_p7 }
 0x16d   : > { %p2794_p12 = pnand %p2793_p11, %p2787_p9 }
 0x16f   : > { %2797 = shalt.err (!%p2794_p12)
}
 0x170   : > { %2331 = dma.hbm_to_vmem [thread:$0]  (!%p3123_p6), %s3722_s15, 16, %s697_s18, [#allocation21]  }
 0x171   : > { %s2798_s7 = scalar_lea.hbm %s3723_s16, 256 }
 0x172   : > { %p2799_p13 = scmp.ne.s32.totalorder %s3723_s16, %s2798_s7  ;;  %p2805_p3 = scmp.lt.u32.totalorder %s2798_s7, %s3723_s16 }
 0x174   : > { %p2801_p0 = pnand %p2799_p13, %p3139_p8 }
 0x176   : > { %p2802_p1 = pneg %p2801_p0 }
 0x178   : > { %p2807_p2 = pnand %p2805_p3, %p2802_p1 }
 0x17a   : > { %2810 = shalt.err (!%p2807_p2)
}
 0x17b   : > { %s2811_s26 = scalar_lea.vmem %s707_s21, 256  ;;  %p2819_p4 = scmp.lt.s32.totalorder %s707_s21, %s707_s21 }
 0x17c   : > { %p2812_p5 = scmp.ne.s32.totalorder %s707_s21, %s2811_s26  ;;  %p2820_p10 = scmp.lt.s32.totalorder %s2811_s26, %s2811_s26 }
 0x17e   : > { %p2814_p7 = pnand %p2812_p5, %p3139_p8  ;;  %p2821_p11 = por %p2820_p10, %p2819_p4 }
 0x180   : > { %p2815_p9 = pneg %p2814_p7 }
 0x182   : > { %p2822_p12 = pnand %p2821_p11, %p2815_p9 }
 0x184   : > { %2825 = shalt.err (!%p2822_p12)
}
 0x185   : > { %2334 = dma.hbm_to_vmem [thread:$0]  (!%p3123_p6), %s3723_s16, 256, %s707_s21, [#allocation24], %s3782_s13, %s3782_s13, %s3781_s2  }
 0x186   : > { %s2024_s6 = sadd.s32 4294967294, %s2950_s30   ;;  %s3407_s5 = sadd.s32 1, %s2950_s30  }
 0x187   : > { %s52_s12 = sadd.s32 1, %s2946_s29  ;;  %s49_s25 = ssub.s32 %s2950_s30, %s3407_s5 }
 0x188   : > { %p59_p8 = scmp.ne.s32.totalorder %s2946_s29, %s2942_s28  ;;  %p50_p13 = scmp.eq.s32.totalorder %s49_s25, 0 }
 0x189   : > { %p60_p0 = scmp.eq.s32.totalorder %s2950_s30, 0  ;;  %p65_p1 = scmp.ne.s32.totalorder %s2942_s28, %s2938_s3 }
 0x18a   : > { %p530_p3 = scmp.eq.s32.totalorder %s3107_s23, 1  ;;  %p3789_p5 = scmp.eq.s32.totalorder %s3107_s23, 0 }
 0x18b   : > { %s3419_s27 = scalar_select %p50_p13, %s2946_s29, %s52_s12  }
 0x18c   : > { %p61_p2 = por %p60_p0, %p59_p8  ;;  %p3423_p7 = por %p3789_p5, %p65_p1 }
 0x18d   : > { %p3427_p6 = por %p530_p3, %p59_p8  ;;  %p536_p9 = scmp.eq.s32.totalorder %s2024_s6, 1 }
 0x18e   : > { %p2356_p4 = scmp.lt.s32.totalorder %s2950_s30, 2  ;;  %s735_s13 = sand.u32 1, %s2946_s29  }
 0x18f   : > { %s3791_s2 = scalar_select %p3427_p6, 1, 0 }
 0x190   : > { %p3433_p10 = por %p536_p9, %p65_p1  ;;  %s2040_s7 = sshll.u32 %s735_s13, 3 }
 0x191   : > { %s2041_s9 = sshll.u32 %s2950_s30, 7  ;;  %s3793_s14 = sld [smem:[#allocation35_spill]] }
 0x192   : > { %s3792_s21 = scalar_select %p3433_p10, 1, 0 }
 0x193   : > { %s739_s18 = scalar_lea.vmem [#allocation2], %s2040_s7  ;;  %p3443_p11 = pnand %p2356_p4, %p61_p2 }
 0x194   : > { %s746_s4 = sshll.u32 %s739_s18, 4  ;;  %s736_s12 = scalar_lea.sflag [#allocation3], %s735_s13  ;;  %s3447_s4 = int_to_ptr.vmem [resolvable:$true] %s746_s4 }
 0x195   : > { %p2828_p8 = pneg %p3443_p11 }
 0x197   : > { %s3441_s26 = scalar_lea.hbm %s3793_s14, %s2041_s9  ;;  %s2831_s11 = scalar_lea.hbm %s3793_s14, 256 }
 0x198   : > { %s2826_s25 = scalar_lea.hbm %s3441_s26, 128  ;;  %p2832_p1 = scmp.lt.u32.totalorder %s3441_s26, %s3793_s14 }
 0x199   : > { %p2827_p12 = scmp.ne.s32.totalorder %s3441_s26, %s2826_s25  ;;  %p2833_p3 = scmp.lt.u32.totalorder %s2831_s11, %s2826_s25 }
 0x19a   : > { %p2835_p5 = scmp.lt.u32.totalorder %s2826_s25, %s3441_s26 }
 0x19b   : > { %p2829_p13 = pnand %p2828_p8, %p2827_p12  ;;  %p2834_p2 = por %p2833_p3, %p2832_p1 }
 0x19d   : > { %p2830_p0 = pneg %p2829_p13  ;;  %p2836_p9 = por %p2835_p5, %p2834_p2 }
 0x19f   : > { %p2837_p4 = pnand %p2836_p9, %p2830_p0 }
 0x1a1   : > { %2840 = shalt.err (!%p2837_p4)
}
 0x1a2   : > { %s2841_s13 = scalar_lea.vmem %s3447_s4, 128  ;;  %s2967_s9 = smov [#allocation2]  }
 0x1a3   : > { %p2842_p12 = scmp.ne.s32.totalorder %s3447_s4, %s2841_s13  ;;  %s2846_s7 = sshll.u32 %s2967_s9, 4  ;;  %s2847_s7 = int_to_ptr.vmem [resolvable:$false] %s2846_s7 }
 0x1a4   : > { %s2848_s20 = scalar_lea.vmem %s2847_s7, 256  ;;  %p2849_p6 = scmp.lt.s32.totalorder %s3447_s4, %s2847_s7 }
 0x1a5   : > { %p2844_p13 = pnand %p2842_p12, %p2828_p8  ;;  %p2850_p1 = scmp.lt.s32.totalorder %s2848_s20, %s2841_s13 }
 0x1a7   : > { %p2845_p10 = pneg %p2844_p13  ;;  %p2851_p3 = por %p2850_p1, %p2849_p6 }
 0x1a9   : > { %p2852_p2 = pnand %p2851_p3, %p2845_p10 }
 0x1ab   : > { %2855 = shalt.err (!%p2852_p2)
}
 0x1ac   : > { %2338 = dma.hbm_to_vmem [thread:$0]  (!%p3443_p11), %s3441_s26, 128, %s3447_s4, %s736_s12  }
 0x1ad   : > { %p3795_p0 = scmp.ne.s32.totalorder %s3773_s1, 0 }
 0x1ae   : > { %s3477_s25 = sand.u32 (!%p3795_p0), 1, %s2942_s28  }
 0x1af   : > { %755 = sbr.rel (%p3795_p0) target bundleno = 1875 (0x753), region = 108  ;;  %s2043_s11 = sshll.u32 (!%p3795_p0), %s3477_s25, 3 }
 0x1b0   : > { %s758_s18 = scalar_lea.sflag (!%p3795_p0), [#allocation3], %s3477_s25  ;;  %s761_s13 = scalar_lea.vmem (!%p3795_p0), [#allocation2], %s2043_s11 }
 0x1b6   : > { %2901 = dma.done.wait (%p3423_p7), %s758_s18, 128  }
 0x1b7   : > { %2903 = vsyncadd (%p3423_p7), %s758_s18, 4294967168  ;;  %p3796_p6 = scmp.eq.s32.totalorder %s3107_s23, 0 }
 0x1b9   : > { %2905 = dma.done.wait (%p3796_p6), [#allocation6], 512   ;;  %p3797_p10 = pmov %p3796_p6 }
 0x1ba   : > { %p3798_p11 = pmov %p3796_p6 }
 0x1bb   : > { %2907 = vsyncadd (%p3797_p10), [#allocation6], 4294966784 }
 0x1bc   : > { %2909 = dma.done.wait (%p3798_p11), [#allocation9], 512   ;;  %p3799_p8 = pmov %p3796_p6 }
 0x1bd   : > { %p3800_p5 = pmov %p3796_p6 }
 0x1be   : > { %2911 = vsyncadd (%p3799_p8), [#allocation9], 4294966784 }
 0x1bf   : > { %2913 = dma.done.wait (%p3800_p5), [#allocation12], 32   ;;  %p3801_p9 = pmov %p3800_p5 }
 0x1c0   : > { %p3802_p7 = pmov %p3800_p5 }
 0x1c1   : > { %2915 = vsyncadd (%p3801_p9), [#allocation12], 4294967264 }
 0x1c2   : > { %2917 = dma.done.wait (%p3802_p7), [#allocation15], 32   ;;  %p3803_p4 = pmov %p3800_p5 }
 0x1c4   : > { %2919 = vsyncadd (%p3803_p4), [#allocation15], 4294967264  ;;  %p3804_p12 = pmov %p3803_p4 }
 0x1c5   : > { %p3805_p13 = pmov %p3803_p4 }
 0x1c6   : > { %2921 = dma.done.wait (%p3804_p12), [#allocation18], 784  }
 0x1c7   : > { %2923 = vsyncadd (%p3805_p13), [#allocation18], 4294966512  ;;  %p3806_p1 = pmov %p3803_p4 }
 0x1c9   : > { %2925 = dma.done.wait (%p3806_p1), [#allocation21], 32   ;;  %p3807_p3 = pmov %p3806_p1 }
 0x1ca   : > { %p3808_p2 = pmov %p3806_p1 }
 0x1cb   : > { %2927 = vsyncadd (%p3807_p3), [#allocation21], 4294967264 }
 0x1cc   : > { %2929 = dma.done.wait (%p3808_p2), [#allocation24], 256   ;;  %p3809_p0 = pmov %p3806_p1 }
 0x1cd   : > { %v2968_v0 = vmov 0.0   ;;  %vm2969_vm0 = vmmov 0   ;;  %v2420_v1 = vld [vmem:[#allocation5] sm:$0xff]   ;;  %v2421_v2 = vld [vmem:[#allocation5 + $0x8] sm:$0xff]   ;;  %v875_v3 = vld [vmem:[%s761_s13] sm:$0xff]  ;;  %vm900_vm1 = vcmask 261120   ;;  %v1133_v15 = vlaneseq }
 0x1ce   : > { %2931 = vsyncadd (%p3809_p0), [#allocation24], 4294967040  ;;  %2143 = vmatprep.subr.bf16.mxu0 %v2968_v0  ;;  %2147 = vmatprep.mubr.msk.bf16.mxu0 %vm2969_vm0, %v2968_v0  ;;  %v2422_v4 = vld [vmem:[#allocation7] sm:$0xff]   ;;  %v880_v5 = vpack.c.bf16 %v875_v3, %v875_v3  ;;  %v2424_v6 = vld [vmem:[#allocation7 + $0x8] sm:$0xff]   ;;  %s3810_s26 = sld [smem:[#allocation46_spill]]  ;;  %s3811_s7 = sld [smem:[#allocation47_spill]] }
 0x1cf   : > { %2151 = vmatprep.subr.bf16.mxu1 %v2968_v0  ;;  %2155 = vmatprep.mubr.msk.bf16.mxu1 %vm2969_vm0, %v2968_v0  ;;  %v2423_v7 = vld [vmem:[#allocation8] sm:$0xff]   ;;  %v2425_v8 = vld [vmem:[#allocation8 + $0x8] sm:$0xff]   ;;  %v2426_v9 = vld [vmem:[#allocation10] sm:$0xff]   ;;  %v3545_v16 = vshrl.u32 %v1133_v15, 7  ;;  %s3812_s13 = sld [smem:[#allocation48_spill]]  ;;  %s3813_s20 = sld [smem:[#allocation54_spill]] }
 0x1d0   : > { %2144 = vmatpush3.bf16.msra.mxu0 %v2420_v1  ;;  %2152 = vmatpush3.bf16.msra.mxu1 %v2422_v4  ;;  %v2427_v10 = vld [vmem:[#allocation10 + $0x8] sm:$0xff]   ;;  %v2430_v12 = vld [vmem:[#allocation17] sm:$0xff]   ;;  %v2429_v13 = vld [vmem:[#allocation17 + $0x18] sm:$0xff]   ;;  %s3814_s0 = sld [smem:[#allocation52_spill]]  ;;  %s3815_s12 = sld [smem:[#allocation53_spill]] }
 0x1d1   : > { %2145 = vmatprep.subr.bf16.mxu0 %v2968_v0  ;;  %2153 = vmatprep.subr.bf16.mxu1 %v2968_v0  ;;  %v2428_v11 = vld [vmem:[#allocation17 + $0x10] sm:$0xff]   ;;  %v2431_v14 = vld [vmem:[#allocation17 + $0x8] sm:$0xff]   ;;  %v2058_v17 = vld [vmem:[#allocation11] ss:$0 sm:$0xff]  ;;  %v1136_v18 = vadd.s32 4294967295, %v3545_v16  ;;  %v1263_v21 = vadd.s32 1, %v3545_v16 }
 0x1d2   : > { %v2432_v24 = vld [vmem:[#allocation17 + $0x20] sm:$0xff]   ;;  %v2433_v34 = vld [vmem:[#allocation17 + $0x28] sm:$0xff]   ;;  %v2083_v58 = vld [vmem:[#allocation19] ss:$0 sm:$0xff]  ;;  %vm1574_vm4 = vcmp.ge.s32.totalorder %v3545_v16, 1  ;;  %vm1604_vm5 = vcmp.ge.s32.totalorder %v3545_v16, 2 }
 0x1d3   : > { %vm1137_vm2 = vcmp.ge.s32.totalorder %v1136_v18, 0  ;;  %vm1265_vm3 = vcmp.lt.s32.totalorder %v1263_v21, 8  ;;  %vm1634_vm6 = vcmp.ge.s32.totalorder %v3545_v16, 4  ;;  %s3816_s18 = sld [smem:[#allocation50_spill]]  ;;  %s2104_s9 = sshll.u32 %s3107_s23, 7 }
 0x1d4   : > { %2146 = vmatpush3.bf16.msra.mxu0 %v2421_v2  ;;  %2154 = vmatpush3.bf16.msra.mxu1 %v2424_v6  ;;  %v2434_v46 = vld [vmem:[%s3810_s26] sm:$0xff]   ;;  %v2435_v47 = vld [vmem:[%s3810_s26 + $0x8] sm:$0xff]   ;;  %s3818_s8 = sld [smem:[#allocation55_spill]]  ;;  %s1817_s23 = scalar_lea.sflag [#allocation4], %s3477_s25 }
 0x1d5   : > { %2159 = vmatprep.subr.bf16.mxu0 %v2968_v0  ;;  %2167 = vmatprep.subr.bf16.mxu1 %v2968_v0  ;;  %p3819_p10 = scmp.ne.s32.totalorder %s3791_s2, 0  ;;  %s2970_s4 = smov [#allocation25]  }
 0x1d6   : > { %s2860_s6 = sshll.u32 %s2970_s4, 4  ;;  %s2861_s6 = int_to_ptr.vmem [resolvable:$false] %s2860_s6 }
 0x1d7   : > { %2148 = vmatmul.mubr.msk.bf16.vlgmr.msra.gmra.mrb[0].mxu0 %vm900_vm1, %v880_v5  ;;  %2156 = vmatmul.mubr.msk.bf16.vlgmr.msra.gmra.mrb[0].mxu1 %vm900_vm1, %v880_v5 }
 0x1d8   : > { %2160 = vmatpush3.bf16.msra.mxu0 %v2423_v7  ;;  %2163 = vmatprep.mubr.msk.bf16.mxu0 %vm2969_vm0, %v2968_v0 }
 0x1d9   : > { %2161 = vmatprep.subr.bf16.mxu0 %v2968_v0  ;;  %2168 = vmatpush3.bf16.msra.mxu1 %v2426_v9  ;;  %v2437_v9 = vld [vmem:[%s3812_s13] sm:$0xff]  }
 0x1da   : > { %2171 = vmatprep.mubr.msk.bf16.mxu1 %vm2969_vm0, %v2968_v0  ;;  %2169 = vmatprep.subr.bf16.mxu1 %v2968_v0  ;;  %s3662_s10 = scalar_lea.hbm %s3818_s8, %s2104_s9 }
 0x1dc   : > { %2162 = vmatpush3.bf16.msra.mxu0 %v2425_v8  ;;  %v2436_v8 = vld [vmem:[%s3811_s7] sm:$0xff]  }
 0x1dd   : > { %2175 = vmatprep.subr.bf16.mxu0 %v2968_v0  ;;  %2170 = vmatpush3.bf16.msra.mxu1 %v2427_v10  ;;  %v2438_v10 = vld [vmem:[%s3811_s7 + $0x8] sm:$0xff]  }
 0x1de   : > { %2183 = vmatprep.subr.bf16.mxu1 %v2968_v0 }
 0x1df   : > { %2164 = vmatmul.mubr.msk.bf16.vlgmr.msra.gmra.mrb[4].mxu0 %vm900_vm1, %v880_v5 }
 0x1e0   : > { %2176 = vmatpush3.bf16.msra.mxu0 %v2428_v11  ;;  %2179 = vmatprep.mubr.msk.bf16.mxu0 %vm2969_vm0, %v2968_v0  ;;  %v2439_v11 = vld [vmem:[%s3812_s13 + $0x8] sm:$0xff]  }
 0x1e1   : > { %2177 = vmatprep.subr.bf16.mxu0 %v2968_v0  ;;  %2172 = vmatmul.mubr.msk.bf16.vlgmr.msra.gmra.mrb[4].mxu1 %vm900_vm1, %v880_v5 }
 0x1e2   : > { %2187 = vmatprep.mubr.msk.bf16.mxu1 %vm2969_vm0, %v2968_v0  ;;  %2184 = vmatpush3.bf16.msra.mxu1 %v2430_v12 }
 0x1e3   : > { %2185 = vmatprep.subr.bf16.mxu1 %v2968_v0 }
 0x1e4   : > { %2178 = vmatpush3.bf16.msra.mxu0 %v2429_v13 }
 0x1e5   : > { %2191 = vmatprep.subr.bf16.mxu0 %v2968_v0 }
 0x1e6   : > { %2186 = vmatpush3.bf16.msra.mxu1 %v2431_v14 }
 0x1e7   : > { %2199 = vmatprep.subr.bf16.mxu1 %v2968_v0 }
 0x2aa   : > { %v938_v19 = vpop.f32.mrb[0].mxu0  ;;  %v3554_v28 = vpop.f32.mrb[0].mxu1 }
 0x2ab   : > { %v3548_v20 = vadd.f32 %v2058_v17, %v938_v19  ;;  %v2149_v22 = vpop.f32.mrb[1].mxu0  ;;  %v2157_v30 = vpop.f32.mrb[1].mxu1 }
 0x2ac   : > { %v941_v23 = vpop.f32.mrb[2].mxu0  ;;  %v1004_v32 = vpop.f32.mrb[2].mxu1 }
 0x2ad   : > { %v1135_v25 = vrot.slane %v3548_v20, 7  ;;  %v1151_v26 = vpack.c.bf16 %v3548_v20, %v3548_v20  ;;  %v2150_v27 = vpop.f32.mrb[3].mxu0  ;;  %v1262_v29 = vrot.slane %v3548_v20, 1  ;;  %v2158_v35 = vpop.f32.mrb[3].mxu1 }
 0x2af   : > { %v1140_v31 = vsel %vm1137_vm2, %v1135_v25, 0.0  ;;  %2180 = vmatmul.mubr.msk.bf16.vlgmr.msra.gmra.mrb[8].mxu0 %vm900_vm1, %v1151_v26  ;;  %v1267_v36 = vsel %vm1265_vm3, %v1262_v29, 0.0 }
 0x2b0   : > { %v1145_v33 = vpack.c.bf16 %v1140_v31, %v1140_v31  ;;  %2192 = vmatpush3.bf16.msra.mxu0 %v2432_v24  ;;  %2195 = vmatprep.mubr.msk.bf16.mxu0 %vm2969_vm0, %v2968_v0  ;;  %v1273_v40 = vpack.c.bf16 %v1267_v36, %v1267_v36 }
 0x2b1   : > { %2193 = vmatprep.subr.bf16.mxu0 %v2968_v0 }
 0x2b2   : > { %2188 = vmatmul.mubr.msk.bf16.vlgmr.msra.gmra.mrb[8].mxu1 %vm900_vm1, %v1145_v33  ;;  %v3562_v37 = vpop.f32.mrb[4].mxu0 }
 0x2b3   : > { %v2165_v38 = vpop.f32.mrb[5].mxu0  ;;  %2203 = vmatprep.mubr.msk.bf16.mxu1 %vm2969_vm0, %v2968_v0  ;;  %2200 = vmatpush3.bf16.msra.mxu1 %v2434_v46 }
 0x2b4   : > { %2194 = vmatpush3.bf16.msra.mxu0 %v2433_v34  ;;  %v1067_v39 = vpop.f32.mrb[6].mxu0  ;;  %v3566_v41 = vpop.f32.mrb[4].mxu1  ;;  %2201 = vmatprep.subr.bf16.mxu1 %v2968_v0 }
 0x2b5   : > { %v2166_v42 = vpop.f32.mrb[7].mxu0  ;;  %2207 = vmatprep.subr.bf16.mxu0 %v2968_v0  ;;  %v2173_v43 = vpop.f32.mrb[5].mxu1 }
 0x2b6   : > { %v1130_v44 = vpop.f32.mrb[6].mxu1 }
 0x2b7   : > { %2196 = vmatmul.mubr.msk.bf16.vlgmr.msra.gmra.mrb[12].mxu0 %vm900_vm1, %v1273_v40  ;;  %v2174_v45 = vpop.f32.mrb[7].mxu1  ;;  %2202 = vmatpush3.bf16.msra.mxu1 %v2435_v47  ;;  %v2062_v47 = vld [vmem:[#allocation13] ss:$0 sm:$0xff] }
 0x2b8   : > { %2211 = vmatprep.mubr.msk.bf16.mxu0 %vm2969_vm0, %v2968_v0  ;;  %2215 = vmatprep.subr.bf16.mxu1 %v2968_v0 }
 0x2b9   : > { %2208 = vmatpush3.bf16.msra.mxu0 %v2436_v8  ;;  %v1573_v8 = vld [vmem:[%s3815_s12] sm:$0x1]  ;;  %s3817_s12 = sld [smem:[#allocation51_spill]] }
 0x2ba   : > { %2209 = vmatprep.subr.bf16.mxu0 %v2968_v0 }
 0x2bd   : > { %2210 = vmatpush3.bf16.msra.mxu0 %v2438_v10 }
 0x2be   : > { %2223 = vmatprep.subr.bf16.mxu0 %v2968_v0 }
 0x382   : > { %v1201_v48 = vpop.f32.mrb[8].mxu0 }
 0x383   : > { %v2181_v49 = vpop.f32.mrb[9].mxu0 }
 0x384   : > { %v1204_v50 = vpop.f32.mrb[10].mxu0  ;;  %v1002_v49 = vadd.f32 %v2062_v47, %v3554_v28 }
 0x385   : > { %v2182_v51 = vpop.f32.mrb[11].mxu0  ;;  %v1256_v52 = vpop.f32.mrb[8].mxu1 }
 0x386   : > { %v1257_v53 = vadd.f32 %v1256_v52, %v1201_v48  ;;  %v2189_v54 = vpop.f32.mrb[9].mxu1 }
 0x387   : > { %v1259_v55 = vpop.f32.mrb[10].mxu1 }
 0x388   : > { %v2190_v56 = vpop.f32.mrb[11].mxu1 }
 0x38a   : > { %v1323_v57 = vpop.f32.mrb[12].mxu0 }
 0x38b   : > { %v1329_v59 = vadd.f32 %v1323_v57, %v1257_v53  ;;  %v2197_v60 = vpop.f32.mrb[13].mxu0  ;;  %v2070_v53 = vld [vmem:[#allocation16] ss:$0 sm:$0xff] }
 0x38c   : > { %v1326_v61 = vpop.f32.mrb[14].mxu0  ;;  %v3614_v28 = vadd.f32 %v2070_v53, %v3566_v41  ;;  %v2092_v60 = vld [vmem:[#allocation22] ss:$0 sm:$0xff] }
 0x38d   : > { %v1337_v62 = vadd.f32 %v2083_v58, %v1329_v59  ;;  %v2198_v63 = vpop.f32.mrb[15].mxu0  ;;  %v2087_v59 = vld [vmem:[#allocation20] ss:$0 sm:$0xff]  ;;  %v2091_v61 = vld [vmem:[%s3813_s20] ss:$0 sm:$0xff]  ;;  %s873_s20 = scalar_lea.vmem [#allocation25], %s2043_s11 }
 0x38e   : > { %v1666_v56 = vsub.f32 0.0, %v3614_v28  ;;  %s1830_s1 = sshll.u32 %s873_s20, 4  ;;  %s3664_s1 = int_to_ptr.vmem [resolvable:$true] %s1830_s1 }
 0x38f   : > { %v1338_v1 = vsub.f32 0.0, %v1337_v62  ;;  %s2856_s11 = scalar_lea.vmem %s3664_s1, 128  ;;  %p2863_p5 = scmp.lt.s32.totalorder %s3664_s1, %s2861_s6 }
 0x390   : > { %v1667_v58 = vmul.f32 1.442695, %v1666_v56  ;;  %p2857_p6 = scmp.ne.s32.totalorder %s3664_s1, %s2856_s11 }
 0x391   : > { %v1339_v2 = vmul.f32 1.442695, %v1338_v1  ;;  %v1572_v1 = vld [vmem:[%s3814_s0] sm:$0x1] }
 0x392   : > { %p2858_p11 = pnand %p2857_p6, %p3819_p10 }
 0x393   : > { %2444 = vpow2.f32 %v1339_v2 }
 0x394   : > { %p2859_p8 = pneg %p2858_p11 }
 0x39d   : > { %v2445_v3 = vpop.eup %2444 }
 0x39e   : > { %v1341_v4 = vadd.f32 1.0, %v2445_v3 }
 0x3a0   : > { %2446 = vrcp.f32 %v1341_v4 }
 0x3aa   : > { %v2447_v5 = vpop.eup %2446 }
 0x3ab   : > { %v1343_v6 = vmul.f32 %v2447_v5, %v1337_v62 }
 0x3ad   : > { %v1348_v7 = vpack.c.bf16 %v1343_v6, %v1343_v6 }
 0x3af   : > { %2204 = vmatmul.mubr.msk.bf16.vlgmr.msra.gmra.mrb[12].mxu1 %vm900_vm1, %v1348_v7 }
 0x3b0   : > { %2219 = vmatprep.mubr.msk.bf16.mxu1 %vm2969_vm0, %v2968_v0  ;;  %2216 = vmatpush3.bf16.msra.mxu1 %v2437_v9 }
 0x3b1   : > { %2217 = vmatprep.subr.bf16.mxu1 %v2968_v0 }
 0x3b4   : > { %2218 = vmatpush3.bf16.msra.mxu1 %v2439_v11 }
 0x3b5   : > { %2231 = vmatprep.subr.bf16.mxu1 %v2968_v0 }
 0x482   : > { %v1398_v12 = vpop.f32.mrb[12].mxu1 }
 0x483   : > { %v1404_v13 = vmul.f32 0.17677669, %v1398_v12  ;;  %v2205_v14 = vpop.f32.mrb[13].mxu1 }
 0x484   : > { %v1401_v15 = vpop.f32.mrb[14].mxu1  ;;  %v1599_v14 = vmul.f32 %v1572_v1, %v1572_v1 }
 0x485   : > { %v1405_v17 = vsel %vm900_vm1, %v1404_v13, -inf  ;;  %v2206_v18 = vpop.f32.mrb[15].mxu1  ;;  %v1600_v15 = vmul.f32 %v1573_v8, %v1573_v8 }
 0x486   : > { %v1406_v19 = vrot.slane %v1405_v17, 4 }
 0x488   : > { %v1407_v21 = vmax.f32 %v1405_v17, %v1406_v19 }
 0x48a   : > { %v1408_v22 = vrot.slane %v1407_v21, 2 }
 0x48c   : > { %v1409_v23 = vmax.f32 %v1407_v21, %v1408_v22  ;;  %v1602_v21 = vmul.f32 2.0, %v1572_v1 }
 0x48e   : > { %v1410_v24 = vrot.slane %v1409_v23, 1 }
 0x490   : > { %v1411_v25 = vmax.f32 %v1409_v23, %v1410_v24 }
 0x492   : > { %v1412_v26 = vsub.f32 %v1404_v13, %v1411_v25 }
 0x494   : > { %v1413_v27 = vmul.f32 1.442695, %v1412_v26  ;;  %v1601_v26 = vsub.f32 %v1599_v14, %v1600_v15 }
 0x496   : > { %2448 = vpow2.f32 %v1413_v27 }
 0x4a0   : > { %v2449_v29 = vpop.eup %2448 }
 0x4a1   : > { %v1415_v30 = vsel %vm900_vm1, %v2449_v29, 0.0 }
 0x4a2   : > { %v1416_v31 = vrot.slane %v1415_v30, 4 }
 0x4a4   : > { %v1417_v32 = vadd.f32 %v1416_v31, %v1415_v30 }
 0x4a6   : > { %v1418_v33 = vrot.slane %v1417_v32, 2 }
 0x4a8   : > { %v1419_v34 = vadd.f32 %v1418_v33, %v1417_v32  ;;  %v1603_v33 = vmul.f32 %v1602_v21, %v1573_v8 }
 0x4aa   : > { %v1420_v35 = vrot.slane %v1419_v34, 1 }
 0x4ac   : > { %v1421_v36 = vadd.f32 %v1420_v35, %v1419_v34 }
 0x4ae   : > { %2450 = vrcp.f32 %v1421_v36 }
 0x4b8   : > { %v2451_v38 = vpop.eup %2450 }
 0x4b9   : > { %v1423_v39 = vmul.f32 %v2451_v38, %v2449_v29 }
 0x4bb   : > { %v1424_v40 = vmul.f32 %v1423_v39, %v3548_v20  ;;  %v2066_v20 = vld [vmem:[#allocation14] ss:$0 sm:$0xff] }
 0x4bc   : > { %v3611_v54 = vadd.f32 %v2066_v20, %v3562_v37  ;;  %v3622_v37 = vsub.s32 0, %v3545_v16 }
 0x4bd   : > { %v1425_v42 = vsel %vm900_vm1, %v1424_v40, 0.0 }
 0x4be   : > { %v1426_v43 = vrot.slane %v1425_v42, 4  ;;  %v1659_v55 = vsub.f32 0.0, %v3611_v54  ;;  %v1583_v12 = vrot.slane %v1572_v1, %v3622_v37  ;;  %v1591_v18 = vrot.slane %v1573_v8, %v3622_v37 }
 0x4bf   : > { %v1613_v39 = vrot.slane %v1601_v26, %v3622_v37 }
 0x4c0   : > { %v1427_v44 = vadd.f32 %v1426_v43, %v1425_v42  ;;  %v1660_v57 = vmul.f32 1.442695, %v1659_v55  ;;  %v1629_v43 = vmul.f32 %v1601_v26, %v1601_v26 }
 0x4c2   : > { %v1428_v45 = vrot.slane %v1427_v44, 2  ;;  %2452 = vpow2.f32 %v1660_v57 }
 0x4c3   : > { %2454 = vpow2.f32 %v1667_v58 }
 0x4c4   : > { %v1429_v46 = vadd.f32 %v1428_v45, %v1427_v44  ;;  %v1630_v44 = vmul.f32 %v1603_v33, %v1603_v33  ;;  %v1621_v45 = vrot.slane %v1603_v33, %v3622_v37 }
 0x4c6   : > { %v1430_v48 = vrot.slane %v1429_v46, 1 }
 0x4c8   : > { %v1431_v50 = vadd.f32 %v1430_v48, %v1429_v46  ;;  %v1632_v48 = vmul.f32 2.0, %v1601_v26 }
 0x4ca   : > { %v1432_v51 = vmul.f32 %v1431_v50, %v1002_v49  ;;  %v1633_v56 = vmul.f32 %v1632_v48, %v1603_v33  ;;  %v2102_v33 = vld [vmem:[%s3817_s12] ss:$0 sm:$0xff]  ;;  %s2862_s12 = scalar_lea.vmem %s2861_s6, 256 }
 0x4cb   : > { %p2864_p9 = scmp.lt.s32.totalorder %s2862_s12, %s2856_s11 }
 0x4cc   : > { %v1438_v52 = vpack.c.bf16 %v1432_v51, %v1432_v51  ;;  %v2453_v25 = vpop.eup %2452  ;;  %v1631_v51 = vsub.f32 %v1629_v43, %v1630_v44 }
 0x4cd   : > { %v2455_v27 = vpop.eup %2454  ;;  %v1662_v34 = vadd.f32 1.0, %v2453_v25  ;;  %p2865_p7 = por %p2864_p9, %p2863_p5 }
 0x4ce   : > { %2212 = vmatmul.mubr.msk.bf16.vlgmr.msra.gmra.mrb[16].mxu0 %vm900_vm1, %v1438_v52  ;;  %2220 = vmatmul.mubr.msk.bf16.vlgmr.msra.gmra.mrb[16].mxu1 %vm900_vm1, %v1438_v52  ;;  %v1669_v38 = vadd.f32 1.0, %v2455_v27 }
 0x4cf   : > { %2227 = vmatprep.mubr.msk.bf16.mxu0 %vm2969_vm0, %v2968_v0  ;;  %2235 = vmatprep.mubr.msk.bf16.mxu1 %vm2969_vm0, %v2968_v0  ;;  %2456 = vrcp.f32 %v1662_v34  ;;  %p2866_p4 = pnand %p2865_p7, %p2859_p8 }
 0x4d0   : > { %2458 = vrcp.f32 %v1669_v38 }
 0x4d9   : > { %v2457_v1 = vpop.eup %2456 }
 0x5a1   : > { %v1495_v62 = vpop.f32.mrb[16].mxu0  ;;  %v1565_v41 = vpop.f32.mrb[16].mxu1 }
 0x5a2   : > { %v1496_v63 = vadd.f32 %v2087_v59, %v1495_v62  ;;  %v1566_v2 = vadd.f32 %v2092_v60, %v1565_v41  ;;  %v2213_v3 = vpop.f32.mrb[17].mxu0  ;;  %v2221_v4 = vpop.f32.mrb[17].mxu1  ;;  %v1643_v59 = vrot.slane %v1631_v51, %v3622_v37  ;;  %v1651_v62 = vrot.slane %v1633_v56, %v3622_v37 }
 0x5a3   : > { %v1498_v5 = vpop.f32.mrb[18].mxu0  ;;  %v1568_v6 = vpop.f32.mrb[18].mxu1 }
 0x5a4   : > { %v1507_v7 = vmul.f32 %v2091_v61, %v1496_v63  ;;  %v1571_v9 = vmul.f32 %v2091_v61, %v1566_v2  ;;  %v2214_v10 = vpop.f32.mrb[19].mxu0  ;;  %v2222_v11 = vpop.f32.mrb[19].mxu1 }
 0x5a5   : > { %v2459_v4 = vpop.eup %2458 }
 0x5a6   : > { %v1575_v13 = vrot.slane %v1507_v7, 7  ;;  %v1577_v17 = vrot.slane %v1571_v9, 7  ;;  %v1671_v16 = vmul.f32 %v2459_v4, %v3614_v28  ;;  %v2443_v28 = vld [vmem:[#allocation23 + $0x8] sm:$0xff]  }
 0x5a8   : > { %v1576_v19 = vsel %vm1574_vm4, %v1575_v13, 0.0  ;;  %v1578_v22 = vsel %vm1574_vm4, %v1577_v17, 0.0 }
 0x5a9   : > { %v1585_v23 = vmul.f32 %v1583_v12, %v1576_v19  ;;  %v1595_v24 = vmul.f32 %v1583_v12, %v1578_v22  ;;  %v1597_v30 = vmul.f32 %v1591_v18, %v1576_v19  ;;  %v1593_v31 = vmul.f32 %v1591_v18, %v1578_v22  ;;  %v2440_v18 = vld [vmem:[%s3816_s18] sm:$0xff]   ;;  %v2441_v19 = vld [vmem:[#allocation23] sm:$0xff]  }
 0x5aa   : > { %2224 = vmatpush3.bf16.msra.mxu0 %v2440_v18  ;;  %2232 = vmatpush3.bf16.msra.mxu1 %v2441_v19 }
 0x5ab   : > { %v1586_v29 = vadd.f32 %v1585_v23, %v1507_v7  ;;  %v1596_v32 = vadd.f32 %v1595_v24, %v1571_v9  ;;  %v1664_v9 = vmul.f32 %v2457_v1, %v3611_v54  ;;  %v2442_v54 = vld [vmem:[%s3816_s18 + $0x8] sm:$0xff]   ;;  %2225 = vmatprep.subr.bf16.mxu0 %v2968_v0  ;;  %2233 = vmatprep.subr.bf16.mxu1 %v2968_v0 }
 0x5ad   : > { %v1594_v35 = vsub.f32 %v1586_v29, %v1593_v31  ;;  %v1598_v36 = vadd.f32 %v1597_v30, %v1596_v32 }
 0x5ae   : > { %2226 = vmatpush3.bf16.msra.mxu0 %v2442_v54  ;;  %2234 = vmatpush3.bf16.msra.mxu1 %v2443_v28 }
 0x5af   : > { %v1605_v40 = vrot.slane %v1594_v35, 6  ;;  %v1607_v42 = vrot.slane %v1598_v36, 6 }
 0x5b1   : > { %v1606_v46 = vsel %vm1604_vm5, %v1605_v40, 0.0  ;;  %v1608_v47 = vsel %vm1604_vm5, %v1607_v42, 0.0 }
 0x5b2   : > { %v1615_v49 = vmul.f32 %v1613_v39, %v1606_v46  ;;  %v1625_v50 = vmul.f32 %v1613_v39, %v1608_v47  ;;  %v1623_v20 = vmul.f32 %v1621_v45, %v1608_v47  ;;  %v1627_v55 = vmul.f32 %v1621_v45, %v1606_v46 }
 0x5b4   : > { %v1616_v52 = vadd.f32 %v1615_v49, %v1594_v35  ;;  %v1626_v53 = vadd.f32 %v1625_v50, %v1598_v36 }
 0x5b6   : > { %v1628_v57 = vadd.f32 %v1627_v55, %v1626_v53  ;;  %v1624_v58 = vsub.f32 %v1616_v52, %v1623_v20 }
 0x5b8   : > { %v1635_v60 = vrot.slane %v1624_v58, 4  ;;  %v1637_v61 = vrot.slane %v1628_v57, 4 }
 0x5ba   : > { %v1636_v41 = vsel %vm1634_vm6, %v1635_v60, 0.0  ;;  %v1638_v63 = vsel %vm1634_vm6, %v1637_v61, 0.0 }
 0x5bb   : > { %v1645_v2 = vmul.f32 %v1643_v59, %v1636_v41  ;;  %v1655_v3 = vmul.f32 %v1643_v59, %v1638_v63  ;;  %v1653_v6 = vmul.f32 %v1651_v62, %v1638_v63  ;;  %v1657_v8 = vmul.f32 %v1651_v62, %v1636_v41 }
 0x5bd   : > { %v1646_v5 = vadd.f32 %v1645_v2, %v1624_v58  ;;  %v1656_v7 = vadd.f32 %v1655_v3, %v1628_v57 }
 0x5bf   : > { %v1654_v10 = vsub.f32 %v1646_v5, %v1653_v6  ;;  %v1658_v11 = vadd.f32 %v1657_v8, %v1656_v7 }
 0x5c1   : > { %v1665_v12 = vmul.f32 %v1664_v9, %v1654_v10  ;;  %v1672_v13 = vmul.f32 %v1671_v16, %v1658_v11 }
 0x5c3   : > { %v1673_v14 = vmul.f32 %v1665_v12, %v1665_v12  ;;  %v1677_v15 = vmul.f32 %v1672_v13, %v1672_v13 }
 0x5c5   : > { %v1674_v37 = vsel %vm900_vm1, %v1673_v14, 0.0  ;;  %v1678_v17 = vsel %vm900_vm1, %v1677_v15, 0.0 }
 0x5c6   : > { %1675 = vadd.xlane.f32.xlu0 %v1674_v37 }
 0x5ca   : > { %1679 = vadd.xlane.f32.xlu0 %v1678_v17 }
 0x653   : > { %v1676_v21 = vpop.xlane.xlu0 %1675 }
 0x657   : > { %v1680_v22 = vpop.xlane.xlu0 %1679 }
 0x658   : > { %v1681_v23 = vadd.f32 %v1680_v22, %v1676_v21 }
 0x65a   : > { %v1682_v24 = vmul.f32 0.015625, %v1681_v23 }
 0x65c   : > { %v1683_v25 = vadd.f32 1e-05, %v1682_v24 }
 0x65e   : > { %2460 = vrsqrt.f32 %v1683_v25 }
 0x668   : > { %v2461_v26 = vpop.eup %2460 }
 0x669   : > { %v1686_v27 = vmul.f32 %v2461_v26, %v1672_v13  ;;  %v1685_v29 = vmul.f32 %v2461_v26, %v1665_v12 }
 0x66b   : > { %v1696_v30 = vpack.c.bf16 %v1686_v27, %v1686_v27  ;;  %v1691_v31 = vpack.c.bf16 %v1685_v29, %v1685_v29 }
 0x66d   : > { %2228 = vmatmul.mubr.msk.bf16.vlgmr.msra.gmra.mrb[20].mxu0 %vm900_vm1, %v1696_v30  ;;  %2236 = vmatmul.mubr.msk.bf16.vlgmr.msra.gmra.mrb[20].mxu1 %vm900_vm1, %v1691_v31 }
 0x740   : > { %v1746_v0 = vpop.f32.mrb[20].mxu0  ;;  %v1801_v32 = vpop.f32.mrb[20].mxu1 }
 0x741   : > { %v1802_v34 = vadd.f32 %v1801_v32, %v1746_v0  ;;  %v2229_v35 = vpop.f32.mrb[21].mxu0  ;;  %v2237_v36 = vpop.f32.mrb[21].mxu1 }
 0x742   : > { %v1749_v38 = vpop.f32.mrb[22].mxu0  ;;  %v1804_v39 = vpop.f32.mrb[22].mxu1 }
 0x743   : > { %v1814_v40 = vadd.f32 %v2102_v33, %v1802_v34  ;;  %v2230_v42 = vpop.f32.mrb[23].mxu0  ;;  %v2238_v43 = vpop.f32.mrb[23].mxu1 }
 0x745   : > { %1815 = vst.msk [vmem:[%s873_s20] sm:$0xff] %vm900_vm1, %v1814_v40 }
 0x746   : > { %2869 = shalt.err (!%p2866_p4)
}
 0x747   : > { %s2870_s25 = scalar_lea.hbm %s3662_s10, 128  ;;  %s2874_s20 = scalar_lea.hbm %s3818_s8, 256 }
 0x748   : > { %p2871_p12 = scmp.ne.s32.totalorder %s3662_s10, %s2870_s25  ;;  %p2875_p3 = scmp.lt.u32.totalorder %s3662_s10, %s3818_s8 }
 0x749   : > { %p2876_p2 = scmp.lt.u32.totalorder %s2874_s20, %s2870_s25  ;;  %p2878_p6 = scmp.lt.u32.totalorder %s2870_s25, %s3662_s10 }
 0x74a   : > { %p2872_p13 = pnand %p2871_p12, %p3819_p10 }
 0x74b   : > { %p2877_p0 = por %p2876_p2, %p2875_p3 }
 0x74c   : > { %p2873_p1 = pneg %p2872_p13 }
 0x74d   : > { %p2879_p11 = por %p2878_p6, %p2877_p0 }
 0x74f   : > { %p2880_p8 = pnand %p2879_p11, %p2873_p1 }
 0x751   : > { %2883 = shalt.err (!%p2880_p8)
}
 0x752   : > { %2293 = dma.vmem_to_hbm [thread:$0]  (%p3819_p10), %s3664_s1, 128, %s3662_s10, %s1817_s23  }
 0x753 PF: > { %s1842_s11 = sand.u32 1, %s2938_s3   ;;  %p3820_p5 = scmp.ne.s32.totalorder %s3792_s21, 0 }
 0x754   : > { %p3821_p9 = scmp.ge.s32.totalorder %s2950_s30, 2  ;;  %s1843_s6 = scalar_lea.sflag [#allocation4], %s1842_s11 }
 0x756   : > { %p2340_p7 = pnand %p3821_p9, %p3820_p5 }
 0x758   : > { %2933 = dma.done.wait (!%p2340_p7), %s1843_s6, 128  }
 0x759   : > { %2935 = vsyncadd (!%p2340_p7), %s1843_s6, 4294967168  ;;  %p42_p4 = scmp.ge.s32.totalorder %s3407_s5, 4   ;;  %s3822_s3 = smov %s2942_s28 }
 0x75a   : > { %s3823_s28 = smov %s2946_s29  ;;  %s3824_s29 = smov %s3419_s27 }
 0x75b   : > { %s3825_s30 = smov %s3407_s5  ;;  %44 = sbr.rel (!%p42_p4) target bundleno = 34 (0x22), region = 207 }
 0x762   :  { %1848 = vsyncpa [#allocation3], 1 }
 0x763   :  { %1850 = vsyncpa [#allocation3 + $0x1], 1 }
 0x764   :  { %1851 = vsyncpa [#allocation6], 1 }
 0x765   :  { %1852 = vsyncpa [#allocation9], 1 }
 0x766   :  { %1853 = vsyncpa [#allocation12], 1 }
 0x767   :  { %1854 = vsyncpa [#allocation15], 1 }
 0x768   :  { %1855 = vsyncpa [#allocation18], 1 }
 0x769   :  { %1856 = vsyncpa [#allocation21], 1 }
 0x76a   :  { %1857 = vsyncpa [#allocation24], 1 }
 0x76b   :  { %1858 = vsyncpa [#allocation4], 1 }
 0x76c   :  { %1860 = vsyncpa [#allocation4 + $0x1], 1 }

</bundles_post_ra>
